<compile_context>
chip_gen: v7x
topology: tpu7x:2x2x1
jax: 0.10.0
libtpu: 0.0.40
codegen_flags: <defaults>
</compile_context>

<pallas_src>
import functools

import numpy as np
import jax
import jax.numpy as jnp
from jax.experimental import pallas as pl
from jax.experimental.pallas import tpu as pltpu

_EPS = 1e-5
_VMEM_SPEC = pl.BlockSpec(memory_space=pltpu.MemorySpace.VMEM)
# Explicit, generation-safe VMEM budget (worst-case per-call footprint ~4 MiB;
# v7x scoped default is 32 MiB over 64 MiB physical).
_VMEM_LIMIT_BYTES = 32 * 1024 * 1024


def _round_up(x, m):
    return ((x + m - 1) // m) * m


def _pick_tile(dim, cap, align):
    """Largest multiple of `align` <= cap that divides `dim` (dim % align == 0)."""
    assert dim % align == 0, (dim, align)
    t = min(cap, dim)
    t -= t % align
    while t > align and dim % t:
        t -= align
    return max(t, align)


def _detect_multi_tc():
    """True on chips with 2 TensorCores sharing a chip (v4 / v5p / v7x)."""
    try:
        kind = jax.devices()[0].device_kind.lower()
    except Exception:
        return False
    if "lite" in kind or "v5e" in kind or "v6e" in kind:
        return False
    return any(t in kind for t in ("v4", "v5p", "v7", "7x"))


_MULTI_TC = _detect_multi_tc()


# ---------------------------------------------------------------------------
# Pallas kernels
# ---------------------------------------------------------------------------
def _fused_matmul_kernel(*refs, relu: bool, has_res: bool):
    """Tiled: acc += x_tile @ w_tile; at last K step apply bias/residual/ReLU."""
    if has_res:
        x_ref, w_ref, b_ref, r_ref, o_ref, acc_ref = refs
    else:
        x_ref, w_ref, b_ref, o_ref, acc_ref = refs
        r_ref = None
    k = pl.program_id(2)

    @pl.when(k == 0)
    def _init():
        acc_ref[...] = jnp.zeros_like(acc_ref)

    acc_ref[...] += jnp.dot(x_ref[...], w_ref[...],
                            preferred_element_type=jnp.float32)

    @pl.when(k == pl.num_programs(2) - 1)
    def _finalize():
        y = acc_ref[...] + b_ref[...]                 # f32 epilogue (v5e-safe)
        if r_ref is not None:
            y = y + r_ref[...].astype(jnp.float32)
        if relu:
            y = jnp.maximum(y, 0.0)
        o_ref[...] = y.astype(o_ref.dtype)            # cast only on final store


def _avgpool_fc_kernel(x_ref, w_ref, b_ref, o_ref):
    """Fused global avg-pool + Linear(2048 -> 1) as a VPU multiply+reduce."""
    pooled = jnp.mean(x_ref[...].astype(jnp.float32), axis=1)        # (N, C)
    o_ref[...] = jnp.sum(pooled * w_ref[...], axis=-1, keepdims=True) + b_ref[...]


# ---------------------------------------------------------------------------
# Fused matmul wrapper (traced inside the per-block jits)
# ---------------------------------------------------------------------------
def _weight_spec(tk, tn, deep):
    """Weight BlockSpec; 3-deep pipeline for weight-streaming (small-M) GEMMs."""
    idx = lambda i, j, k: (k, j)
    if deep and hasattr(pl, "Buffered"):
        try:
            return pl.BlockSpec((tk, tn), idx, pipeline_mode=pl.Buffered(3))
        except TypeError:   # older BlockSpec signature without pipeline_mode
            pass
    return pl.BlockSpec((tk, tn), idx)


def _fused_matmul(x, w, bias, residual, *, relu):
    """out = [relu]((x @ w) + bias [+ residual]).

    x: (M, Kx) bf16 activations; w: (Kp, Np) bf16, pre-padded to 128 multiples;
    bias: (1, Np) f32; residual: (M, Np) bf16 or None.
    Returns (Mp, Np) bf16 with Mp = round_up(M, tm); channel padding is kept.
    """
    M, Kx = x.shape
    Kp, Np = w.shape

    # --- tile selection (review: big tiles, divisor-aware K, pad-to-tile M) ---
    tm = min(512, _round_up(M, 16))
    Mp = _round_up(M, tm)
    tk = _pick_tile(Kp, 1536, 128)
    tn = _pick_tile(Np, 512, 128)
    small_m = (Mp == tm)                       # single i block => weight-streaming
    if _MULTI_TC and small_m and Np // tn < 2 and Np >= 256:
        # Keep a splittable "parallel" axis for the second TensorCore.
        tn = _pick_tile(Np, Np // 2, 128)

    xp = x if (Mp == M and Kp == Kx) else jnp.pad(x, ((0, Mp - M), (0, Kp - Kx)))

    has_res = residual is not None
    in_specs = [
        pl.BlockSpec((tm, tk), lambda i, j, k: (i, k)),
        _weight_spec(tk, tn, deep=small_m),
        pl.BlockSpec((1, tn), lambda i, j, k: (0, j)),
    ]
    args = [xp, w, bias]
    if has_res:
        rp = residual if Mp == M else jnp.pad(residual, ((0, Mp - M), (0, 0)))
        in_specs.append(pl.BlockSpec((tm, tn), lambda i, j, k: (i, j)))
        args.append(rp)

    kernel = functools.partial(_fused_matmul_kernel, relu=relu, has_res=has_res)
    return pl.pallas_call(
        kernel,
        out_shape=jax.ShapeDtypeStruct((Mp, Np), jnp.bfloat16),
        grid_spec=pltpu.PrefetchScalarGridSpec(
            num_scalar_prefetch=0,
            grid=(Mp // tm, Np // tn, Kp // tk),
            in_specs=in_specs,
            out_specs=pl.BlockSpec((tm, tn), lambda i, j, k: (i, j)),
            scratch_shapes=[pltpu.VMEM((tm, tn), jnp.float32)],
        ),
        compiler_params=pltpu.CompilerParams(
            dimension_semantics=("parallel", "parallel", "arbitrary"),
            vmem_limit_bytes=_VMEM_LIMIT_BYTES,
            # Let im2col pad/slice/concat producers fuse into the pallas call
            # instead of round-tripping HBM (biggest relative win on v5e).
            allow_input_fusion=[True] * len(args),
        ),
    )(*args)


def _im2col(x, kh, kw, stride, pad):
    """NHWC -> (N*Ho*Wo, kh*kw*C) patch matrix (zero padding, conv semantics)."""
    n, h, w, c = x.shape
    if pad:
        x = jnp.pad(x, ((0, 0), (pad, pad), (pad, pad), (0, 0)))
    ho = (h + 2 * pad - kh) // stride + 1
    wo = (w + 2 * pad - kw) // stride + 1
    if kh == 1 and kw == 1:
        patches = x[:, ::stride, ::stride, :]
        return patches.reshape(n * ho * wo, c), ho, wo
    taps = []
    for dy in range(kh):
        for dx in range(kw):
            taps.append(x[:, dy:dy + ho * stride:stride, dx:dx + wo * stride:stride, :])
    patches = jnp.concatenate(taps, axis=-1)          # (N, Ho, Wo, kh*kw*C)
    return patches.reshape(n * ho * wo, kh * kw * c), ho, wo


def _conv_bn(x, w2d, bias, residual, *, kh, kw, stride, pad, relu):
    """conv2d (BN folded into w2d/bias) + optional residual + ReLU (padded chans)."""
    n = x.shape[0]
    cout_p = w2d.shape[1]
    cols, ho, wo = _im2col(x, kh, kw, stride, pad)
    m = n * ho * wo
    res = None if residual is None else residual.reshape(m, cout_p)
    y = _fused_matmul(cols, w2d, bias, res, relu=relu)
    return y[:m].reshape(n, ho, wo, cout_p)           # strip row padding only


def _maxpool_3x3_s2(x):
    # Review-sanctioned XLA path: pairwise maximum over 9 shifted strided slices.
    n, h, w, c = x.shape
    xp = jnp.pad(x, ((0, 0), (1, 1), (1, 1), (0, 0)), constant_values=-jnp.inf)
    ho = (h + 2 - 3) // 2 + 1
    wo = (w + 2 - 3) // 2 + 1
    out = None
    for dy in range(3):
        for dx in range(3):
            tap = xp[:, dy:dy + 2 * ho:2, dx:dx + 2 * wo:2, :]
            out = tap if out is None else jnp.maximum(out, tap)
    return out


# ---------------------------------------------------------------------------
# jit boundaries: stem / per-bottleneck / head  (bounded compile count, ~50
# dispatches per forward instead of ~500 separately launched ops)
# ---------------------------------------------------------------------------
@jax.jit
def _stem(x_nchw, w, b):
    x = jnp.transpose(x_nchw.astype(jnp.float32), (0, 2, 3, 1)).astype(jnp.bfloat16)
    x = _conv_bn(x, w, b, None, kh=7, kw=7, stride=2, pad=3, relu=True)
    return _maxpool_3x3_s2(x)


@functools.partial(jax.jit, static_argnames=("stride", "has_down"))
def _bottleneck(x, p, *, stride, has_down):
    out = _conv_bn(x, p["w1"], p["b1"], None, kh=1, kw=1, stride=1, pad=0, relu=True)
    out = _conv_bn(out, p["w2"], p["b2"], None, kh=3, kw=3, stride=stride, pad=1, relu=True)
    if has_down:
        identity = _conv_bn(x, p["wd"], p["bd"], None,
                            kh=1, kw=1, stride=stride, pad=0, relu=False)
    else:
        identity = x
    # conv3 + bias + residual add + ReLU fused into one tiled Pallas kernel.
    return _conv_bn(out, p["w3"], p["b3"], identity,
                    kh=1, kw=1, stride=1, pad=0, relu=True)


@jax.jit
def _head(x_nhwc, fc_w, fc_b):
    n, h, w, c = x_nhwc.shape
    selected = jnp.transpose(x_nhwc, (0, 3, 1, 2)).astype(jnp.float32)
    out = pl.pallas_call(
        _avgpool_fc_kernel,
        out_shape=jax.ShapeDtypeStruct((n, 1), jnp.float32),
        in_specs=[_VMEM_SPEC, _VMEM_SPEC, _VMEM_SPEC],
        out_specs=_VMEM_SPEC,
    )(x_nhwc.reshape(n, h * w, c), fc_w.reshape(1, c), fc_b.reshape(1, 1))
    return out, selected


# ---------------------------------------------------------------------------
# Deterministic synthetic parameters (ResNet-152 shapes, fc: 2048 -> 1)
# BN (inference mode) folded; weights pre-padded (K, N -> mult of 128) + bf16,
# biases pre-shaped to (1, Np) f32 — all done ONCE at init.
# ---------------------------------------------------------------------------
def _conv_params(rng, kh, kw, cin, cout, cin_pad=None):
    if cin_pad is None:
        cin_pad = _round_up(cin, 128)
    cout_p = _round_up(cout, 128)
    std = np.sqrt(2.0 / (kh * kw * cin))
    w = (std * rng.standard_normal((kh, kw, cin, cout))).astype(np.float32)
    gamma = rng.uniform(0.9, 1.1, size=cout).astype(np.float32)
    beta = (0.05 * rng.standard_normal(cout)).astype(np.float32)
    mean = (0.05 * rng.standard_normal(cout)).astype(np.float32)
    var = rng.uniform(0.9, 1.1, size=cout).astype(np.float32)
    scale = gamma / np.sqrt(var + _EPS)
    bias = beta - mean * scale
    # Fold BN scale, pad input channels per tap and output channels, flatten,
    # then pad the flattened K to a multiple of 128 (only matters for the stem).
    wp = np.zeros((kh, kw, cin_pad, cout_p), np.float32)
    wp[:, :, :cin, :cout] = w * scale[None, None, None, :]
    k = kh * kw * cin_pad
    kp = _round_up(k, 128)
    w2d = np.zeros((kp, cout_p), np.float32)
    w2d[:k] = wp.reshape(k, cout_p)
    bp = np.zeros((1, cout_p), np.float32)
    bp[0, :cout] = bias
    return jnp.asarray(w2d, dtype=jnp.bfloat16), jnp.asarray(bp)


def _bottleneck_params(rng, cin, planes, stride):
    w1, b1 = _conv_params(rng, 1, 1, cin, planes)
    w2, b2 = _conv_params(rng, 3, 3, planes, planes)
    w3, b3 = _conv_params(rng, 1, 1, planes, planes * 4)
    arrays = {"w1": w1, "b1": b1, "w2": w2, "b2": b2, "w3": w3, "b3": b3}
    has_down = (stride != 1) or (cin != planes * 4)
    if has_down:
        wd, bd = _conv_params(rng, 1, 1, cin, planes * 4)
        arrays["wd"], arrays["bd"] = wd, bd
    return {"arrays": arrays, "stride": stride, "has_down": has_down}


def init_resnet152_params(seed=0):
    rng = np.random.default_rng(seed)
    params = {}
    params["conv1_w"], params["conv1_b"] = _conv_params(rng, 7, 7, 3, 64, cin_pad=3)
    layers = []
    cin = 64
    for planes, nblocks, stride in [(64, 3, 1), (128, 8, 2), (256, 36, 2), (512, 3, 2)]:
        blocks = []
        for i in range(nblocks):
            blocks.append(_bottleneck_params(rng, cin, planes, stride if i == 0 else 1))
            cin = planes * 4
        layers.append(blocks)
    params["layers"] = layers
    bound = 1.0 / np.sqrt(2048.0)
    params["fc_w"] = jnp.asarray(rng.uniform(-bound, bound, size=(2048, 1)).astype(np.float32))
    params["fc_b"] = jnp.asarray(rng.uniform(-bound, bound, size=(1,)).astype(np.float32))
    return params


# ---------------------------------------------------------------------------
# Forward pass
# ---------------------------------------------------------------------------
def resnet_forward(params, x_nchw):
    """Equivalent of ResNet.forward: returns (fc_out [N,1], layer4 activations NCHW)."""
    x = _stem(x_nchw, params["conv1_w"], params["conv1_b"])
    for blocks in params["layers"]:
        for blk in blocks:
            x = _bottleneck(x, blk["arrays"],
                            stride=blk["stride"], has_down=blk["has_down"])
    # `selected_out` = layer4 forward-hook output (PyTorch NCHW f32); fc head.
    out, selected_out = _head(x, params["fc_w"], params["fc_b"])
    return out, selected_out


if __name__ == "__main__":
    params = init_resnet152_params(seed=0)
    x = jax.random.normal(jax.random.PRNGKey(0), (2, 3, 64, 64), dtype=jnp.float32)
    out, layer4_act = resnet_forward(params, x)
    jax.block_until_ready((out, layer4_act))
    assert out.shape == (2, 1)
    assert layer4_act.shape == (2, 2048, 2, 2)
    assert bool(jnp.all(jnp.isfinite(out)))
    print("KERNEL_OK")
</pallas_src>

<mosaic_0001>
module attributes {stable_mosaic.version = 11 : i64} {
  func.func @_fused_matmul_kernel(%arg0: i32, %arg1: i32, %arg2: i32, %arg3: memref<512x256xbf16, #tpu.memory_space<vmem>>, %arg4: memref<256x128xbf16, #tpu.memory_space<vmem>>, %arg5: memref<1x128xf32, #tpu.memory_space<vmem>>, %arg6: memref<512x128xbf16, #tpu.memory_space<vmem>>, %arg7: memref<512x128xf32, #tpu.memory_space<vmem>>) attributes {dimension_semantics = [#tpu.dimension_semantics<parallel>, #tpu.dimension_semantics<parallel>, #tpu.dimension_semantics<arbitrary>], iteration_bounds = array<i64: 4, 1, 1>, scalar_prefetch = 0 : i64, scratch_operands = 1 : i64, tpu.core_type = #tpu.core_type<tc>, window_params = [{transform_indices = @transform_0, window_bounds = array<i64: 512, 256>}, {transform_indices = @transform_1, window_bounds = array<i64: 256, 128>}, {transform_indices = @transform_2, window_bounds = array<i64: 1, 128>}, {transform_indices = @transform_3, window_bounds = array<i64: 512, 128>}]} {
    %c0_i32 = arith.constant 0 : i32
    %0 = arith.cmpi eq, %arg2, %c0_i32 : i32
    %1 = arith.extui %0 : i1 to i32
    %c0_i32_0 = arith.constant 0 : i32
    %2 = arith.cmpi ne, %1, %c0_i32_0 : i32
    scf.if %2 {
      %cst_10 = arith.constant 0.000000e+00 : f32
      %12 = vector.broadcast %cst_10 : f32 to vector<512x128xf32>
      %c0_11 = arith.constant 0 : index
      %c0_12 = arith.constant 0 : index
      %13 = vector.load %arg7[%c0_11, %c0_12] : memref<512x128xf32, #tpu.memory_space<vmem>>, vector<512x128xf32>
      tpu.vector_store %arg7[%c0_11, %c0_12], %12 {strides = array<i32>} : memref<512x128xf32, #tpu.memory_space<vmem>>, vector<512x128xf32>,
    } else {
    }
    %c0 = arith.constant 0 : index
    %c0_1 = arith.constant 0 : index
    %3 = vector.load %arg7[%c0, %c0_1] : memref<512x128xf32, #tpu.memory_space<vmem>>, vector<512x128xf32>
    %c0_2 = arith.constant 0 : index
    %c0_3 = arith.constant 0 : index
    %4 = vector.load %arg3[%c0_2, %c0_3] : memref<512x256xbf16, #tpu.memory_space<vmem>>, vector<512x256xbf16>
    %c0_4 = arith.constant 0 : index
    %c0_5 = arith.constant 0 : index
    %5 = vector.load %arg4[%c0_4, %c0_5] : memref<256x128xbf16, #tpu.memory_space<vmem>>, vector<256x128xbf16>
    %cst = arith.constant dense<0.000000e+00> : vector<512x128xf32>
    %6 = tpu.matmul %4, %5, %cst {dimension_numbers = #tpu.dot_dimension_numbers<[1], [0], [0], [1], [0, 0, 1, 1], [], []>} : vector<512x256xbf16>, vector<256x128xbf16>, vector<512x128xf32> -> vector<512x128xf32>
    %7 = arith.addf %3, %6 : vector<512x128xf32>
    %c0_6 = arith.constant 0 : index
    %c0_7 = arith.constant 0 : index
    %8 = vector.load %arg7[%c0_6, %c0_7] : memref<512x128xf32, #tpu.memory_space<vmem>>, vector<512x128xf32>
    tpu.vector_store %arg7[%c0_6, %c0_7], %7 {strides = array<i32>} : memref<512x128xf32, #tpu.memory_space<vmem>>, vector<512x128xf32>,
    %c0_i32_8 = arith.constant 0 : i32
    %9 = arith.cmpi eq, %arg2, %c0_i32_8 : i32
    %10 = arith.extui %9 : i1 to i32
    %c0_i32_9 = arith.constant 0 : i32
    %11 = arith.cmpi ne, %10, %c0_i32_9 : i32
    scf.if %11 {
      %c0_10 = arith.constant 0 : index
      %c0_11 = arith.constant 0 : index
      %12 = vector.load %arg7[%c0_10, %c0_11] : memref<512x128xf32, #tpu.memory_space<vmem>>, vector<512x128xf32>
      %c0_12 = arith.constant 0 : index
      %c0_13 = arith.constant 0 : index
      %13 = vector.load %arg5[%c0_12, %c0_13] : memref<1x128xf32, #tpu.memory_space<vmem>>, vector<1x128xf32>
      %14 = vector.broadcast %13 : vector<1x128xf32> to vector<512x128xf32>
      %15 = arith.addf %12, %14 : vector<512x128xf32>
      %cst_14 = arith.constant 0.000000e+00 : f32
      %16 = vector.broadcast %cst_14 : f32 to vector<512x128xf32>
      %17 = arith.maximumf %15, %16 : vector<512x128xf32>
      %18 = arith.truncf %17 : vector<512x128xf32> to vector<512x128xbf16>
      %c0_15 = arith.constant 0 : index
      %c0_16 = arith.constant 0 : index
      %19 = vector.load %arg6[%c0_15, %c0_16] : memref<512x128xbf16, #tpu.memory_space<vmem>>, vector<512x128xbf16>
      tpu.vector_store %arg6[%c0_15, %c0_16], %18 {strides = array<i32>} : memref<512x128xbf16, #tpu.memory_space<vmem>>, vector<512x128xbf16>,
    } else {
    }
    return
  }
  func.func @transform_0(%arg0: i32, %arg1: i32, %arg2: i32) -> (i32, i32) {
    %c0_i32 = arith.constant 0 : i32
    return %arg0, %arg2 : i32, i32
  }
  func.func @transform_1(%arg0: i32, %arg1: i32, %arg2: i32) -> (i32, i32) {
    %c0_i32 = arith.constant 0 : i32
    return %arg2, %arg1 : i32, i32
  }
  func.func @transform_2(%arg0: i32, %arg1: i32, %arg2: i32) -> (i32, i32) {
    %c0_i32 = arith.constant 0 : i32
    %c0_i32_0 = arith.constant 0 : i32
    return %c0_i32, %arg1 : i32, i32
  }
  func.func @transform_3(%arg0: i32, %arg1: i32, %arg2: i32) -> (i32, i32) {
    %c0_i32 = arith.constant 0 : i32
    return %arg0, %arg1 : i32, i32
  }
}

</mosaic_0001>

<bundles_post_ra>
// kernel: _stem.2
= control target key start
LH: loop header
LB: loop body
LE: loop exit
PB: predicated region body
PF: predicated region fallthrough
CT: control target
= control target key end

     0   :  { %s5883_s17 = smov 0   ;;  %s5885_s18 = smov 0   ;;  %s6496_s0 = inlined_call_operand.vmem [shape: bf16[256,128], index: 0, kind: input, shape index: {}]   ;;  %s6497_s1 = inlined_call_operand.vmem [shape: f32[1,128], index: 1, kind: input, shape index: {}]   ;;  %s6498_s2 = inlined_call_operand.vmem [shape: bf16[2048,147], index: 2, kind: input, shape index: {}]   ;;  %s6499_s3 = inlined_call_operand.<no memory space> [shape: bf16[], index: 3, kind: input, shape index: {}]   ;;  %s6500_s4 = inlined_call_operand.vmem [shape: bf16[2048,128], index: 4, kind: output, shape index: {}]  }
   0x1   :  { %v9_v0 = vstv %s6499_s3  ;;  %s5887_s19 = smov 0  }
   0x2   :  { %v5881_v1 = vunpack.i.l.bf16 %v9_v0 }
   0x3 LB: > { %s38_s3 = sadd.s32 1, %s5845_s18  ;;  %p5121_p0 = scmp.ge.s32.totalorder %s5849_s19, 1  ;;  %s5849_s19 = sphi %s5887_s19, %s19_s19   ;;  %s5845_s18 = sphi %s5885_s18, %s6502_s18   ;;  %s5841_s17 = sphi %s5883_s17, %s6501_s17  }
   0x4   : > { %p40_p1 = scmp.ge.s32.totalorder %s38_s3, 4  ;;  %p201_p2 = scmp.lt.s32.totalorder %s5849_s19, 5 }
   0x6   : > { %s6504_s3 = smov (%p40_p1, %s38_s3), 0  ;;  %p202_p3 = pnand %p5121_p0, %p201_p2 }
   0x8   : > { %205 = sbr.rel (%p202_p3) target bundleno = 421 (0x1a5), region = 32 }
   0xf   : > { %v5715_v2 = vld [vmem:[%s6496_s0] sm:$0xff]   ;;  %v5851_v3 = vmov 0   ;;  %s5122_s22 = sshll.u32 %s5841_s17, 6  ;;  %v5716_v4 = vld [vmem:[%s6496_s0 + $0x8] sm:$0xff]   ;;  %v320_v5 = vlaneseq  ;;  %v5717_v6 = vld [vmem:[%s6496_s0 + $0x10] sm:$0xff]   ;;  %v5852_v33 = vmov 0.0  }
  0x10   : > { %4062 = vmatprep.subr.bf16.mxu0 %v5851_v3  ;;  %5657 = vmatprep.subr.bf16.mxu1 %v5851_v3  ;;  %p250_p4 = scmp.lt.s32.totalorder %s5122_s22, 255  ;;  %v5718_v8 = vld [vmem:[%s6496_s0 + $0x18] sm:$0xff]   ;;  %v5719_v10 = vld [vmem:[%s6496_s0 + $0x20] sm:$0xff]   ;;  %v5720_v11 = vld [vmem:[%s6496_s0 + $0x28] sm:$0xff]  }
  0x11   : > { %4063 = vmatpush1.bf16.msra.mxu0 %v5715_v2  ;;  %5673 = vmatpush1.bf16.msra.mxu1 %v5715_v2  ;;  %v321_v7 = vand.u32 127, %v320_v5  ;;  %v5963_v32 = vld [vmem:[%s6496_s0 + $0x30] sm:$0xff]   ;;  %v6008_v62 = vld [vmem:[%s6496_s0 + $0x38] sm:$0xff]  }
  0x12   : > { %4064 = vmatprep.subr.bf16.mxu0 %v5851_v3  ;;  %5658 = vmatprep.subr.bf16.mxu1 %v5851_v3  ;;  %s6506_s22 = smov (!%p250_p4, %s5122_s22), 255 }
  0x13   : > { %s5401_s29 = sshll.u32 %s6506_s22, 3  ;;  %v5924_v9 = vadd.s32 128, %v321_v7  ;;  %s5126_s10 = sshll.u32 %s6506_s22, 2 }
  0x14   : > { %s5929_s6 = scalar_lea.vmem %s6498_s2, %s5401_s29  ;;  %s6393_s13 = scalar_lea.vmem %s6500_s4, %s5126_s10 }
  0x15   : > { %4065 = vmatpush1.bf16.msra.mxu0 %v5716_v4  ;;  %5674 = vmatpush1.bf16.msra.mxu1 %v5716_v4  ;;  %vm324_vm0 = vcmp.lt.s32.totalorder %v5924_v9, 147  ;;  %v283_v12 = vld [vmem:[%s5929_s6] sm:$0xf]  ;;  %v5127_v13 = vld [vmem:[%s5929_s6 + $0x4] ss:$8 sps:$4 sm:$0xff]  }
  0x16   : > { %4066 = vmatprep.subr.bf16.mxu0 %v5851_v3  ;;  %5659 = vmatprep.subr.bf16.mxu1 %v5851_v3  ;;  %v5128_v14 = vld [vmem:[%s5929_s6 + $0x8] sm:$0xf]  ;;  %295 = vst [vmem:[#allocation8] sm:$0xf] %v283_v12  ;;  %v311_v15 = vunpack.c.l.bf16 %v5127_v13  ;;  %v360_v16 = vunpack.c.h.bf16 %v5127_v13  ;;  %v5190_v17 = vld [vmem:[%s5929_s6 + $0x100] sm:$0xf] }
  0x17   : > { %344 = vst [vmem:[#allocation8 + $0x8] sm:$0xf] %v5128_v14  ;;  %v5191_v18 = vld [vmem:[%s5929_s6 + $0x104] ss:$8 sps:$4 sm:$0xff]   ;;  %v5192_v19 = vld [vmem:[%s5929_s6 + $0x108] sm:$0xf] }
  0x18   : > { %1863 = vst [vmem:[#allocation8 + $0x100] sm:$0xf] %v5190_v17  ;;  %v1879_v20 = vunpack.c.l.bf16 %v5191_v18  ;;  %1912 = vst [vmem:[#allocation8 + $0x108] sm:$0xf] %v5192_v19  ;;  %v1928_v21 = vunpack.c.h.bf16 %v5191_v18  ;;  %v5130_v22 = vld [vmem:[%s5929_s6 + $0x10] sm:$0xf]  ;;  %v325_v25 = vsel %vm324_vm0, %v311_v15, %v5881_v1  ;;  %v374_v26 = vsel %vm324_vm0, %v360_v16, %v5881_v1 }
  0x19   : > { %4067 = vmatpush1.bf16.msra.mxu0 %v5717_v6  ;;  %5675 = vmatpush1.bf16.msra.mxu1 %v5717_v6  ;;  %v5131_v23 = vld [vmem:[%s5929_s6 + $0x14] ss:$8 sps:$4 sm:$0xff]   ;;  %v5132_v24 = vld [vmem:[%s5929_s6 + $0x18] sm:$0xf]  ;;  %393 = vst [vmem:[#allocation8 + $0x10] sm:$0xf] %v5130_v22  ;;  %v327_v34 = vpack.c.bf16 %v5852_v33, %v325_v25  ;;  %v376_v35 = vpack.c.bf16 %v5852_v33, %v374_v26 }
  0x1a   : > { %4068 = vmatprep.subr.bf16.mxu0 %v5851_v3  ;;  %5660 = vmatprep.subr.bf16.mxu1 %v5851_v3  ;;  %v409_v27 = vunpack.c.l.bf16 %v5131_v23  ;;  %442 = vst [vmem:[#allocation8 + $0x18] sm:$0xf] %v5132_v24  ;;  %v458_v28 = vunpack.c.h.bf16 %v5131_v23  ;;  %v5194_v29 = vld [vmem:[%s5929_s6 + $0x110] sm:$0xf]  ;;  %v5195_v30 = vld [vmem:[%s5929_s6 + $0x114] ss:$8 sps:$4 sm:$0xff]   ;;  %v1893_v36 = vsel %vm324_vm0, %v1879_v20, %v5881_v1  ;;  %v1942_v37 = vsel %vm324_vm0, %v1928_v21, %v5881_v1 }
  0x1b   : > { %v5196_v31 = vld [vmem:[%s5929_s6 + $0x118] sm:$0xf]  ;;  %1961 = vst [vmem:[#allocation8 + $0x110] sm:$0xf] %v5194_v29  ;;  %v5134_v38 = vld [vmem:[%s5929_s6 + $0x20] sm:$0xf]  ;;  %v1895_v41 = vpack.c.bf16 %v5852_v33, %v1893_v36  ;;  %v1944_v42 = vpack.c.bf16 %v5852_v33, %v1942_v37  ;;  %v1977_v50 = vunpack.c.l.bf16 %v5195_v30  ;;  %v2026_v51 = vunpack.c.h.bf16 %v5195_v30 }
  0x1c   : > { %2010 = vst [vmem:[#allocation8 + $0x118] sm:$0xf] %v5196_v31  ;;  %v5135_v39 = vld [vmem:[%s5929_s6 + $0x24] ss:$8 sps:$4 sm:$0xff]   ;;  %v5136_v40 = vld [vmem:[%s5929_s6 + $0x28] sm:$0xf]  ;;  %v423_v43 = vsel %vm324_vm0, %v409_v27, %v5881_v1  ;;  %v472_v44 = vsel %vm324_vm0, %v458_v28, %v5881_v1 }
  0x1d   : > { %4069 = vmatpush1.bf16.msra.mxu0 %v5718_v8  ;;  %5676 = vmatpush1.bf16.msra.mxu1 %v5718_v8  ;;  %491 = vst [vmem:[#allocation8 + $0x20] sm:$0xf] %v5134_v38  ;;  %540 = vst [vmem:[#allocation8 + $0x28] sm:$0xf] %v5136_v40  ;;  %v5198_v45 = vld [vmem:[%s5929_s6 + $0x120] sm:$0xf]  ;;  %v425_v48 = vpack.c.bf16 %v5852_v33, %v423_v43  ;;  %v474_v49 = vpack.c.bf16 %v5852_v33, %v472_v44  ;;  %v507_v55 = vunpack.c.l.bf16 %v5135_v39 }
  0x1e   : > { %4070 = vmatprep.subr.bf16.mxu0 %v5851_v3  ;;  %5661 = vmatprep.subr.bf16.mxu1 %v5851_v3  ;;  %v5986_v46 = vld [vmem:[%s5929_s6 + $0x124] ss:$8 sps:$4 sm:$0xff]   ;;  %v5200_v47 = vld [vmem:[%s5929_s6 + $0x128] sm:$0xf]  ;;  %329 = vst [vmem:[#allocation8 + $0x4] sm:$0xf] %v327_v34  ;;  %v556_v56 = vunpack.c.h.bf16 %v5135_v39  ;;  %v1991_v63 = vsel %vm324_vm0, %v1977_v50, %v5881_v1  ;;  %v2040_v0 = vsel %vm324_vm0, %v2026_v51, %v5881_v1 }
  0x1f   : > { %378 = vst [vmem:[#allocation8 + $0xc] sm:$0xf] %v376_v35  ;;  %2059 = vst [vmem:[#allocation8 + $0x120] sm:$0xf] %v5198_v45  ;;  %v5138_v52 = vld [vmem:[%s5929_s6 + $0x30] sm:$0xf]  ;;  %v2075_v57 = vunpack.c.l.bf16 %v5986_v46  ;;  %v2124_v58 = vunpack.c.h.bf16 %v5986_v46  ;;  %v1993_v7 = vpack.c.bf16 %v5852_v33, %v1991_v63  ;;  %v2042_v8 = vpack.c.bf16 %v5852_v33, %v2040_v0 }
  0x20   : > { %2108 = vst [vmem:[#allocation8 + $0x128] sm:$0xf] %v5200_v47  ;;  %v5993_v53 = vld [vmem:[%s5929_s6 + $0x34] ss:$8 sps:$4 sm:$0xff]   ;;  %v5140_v54 = vld [vmem:[%s5929_s6 + $0x38] sm:$0xf] }
  0x21   : > { %4071 = vmatpush1.bf16.msra.mxu0 %v5719_v10  ;;  %5677 = vmatpush1.bf16.msra.mxu1 %v5719_v10  ;;  %1897 = vst [vmem:[#allocation8 + $0x104] sm:$0xf] %v1895_v41  ;;  %1946 = vst [vmem:[#allocation8 + $0x10c] sm:$0xf] %v1944_v42  ;;  %v5202_v59 = vld [vmem:[%s5929_s6 + $0x130] sm:$0xf]  ;;  %v605_v2 = vunpack.c.l.bf16 %v5993_v53  ;;  %v654_v4 = vunpack.c.h.bf16 %v5993_v53  ;;  %v521_v10 = vsel %vm324_vm0, %v507_v55, %v5881_v1 }
  0x22   : > { %4072 = vmatprep.subr.bf16.mxu0 %v5851_v3  ;;  %5662 = vmatprep.subr.bf16.mxu1 %v5851_v3  ;;  %589 = vst [vmem:[#allocation8 + $0x30] sm:$0xf] %v5138_v52  ;;  %638 = vst [vmem:[#allocation8 + $0x38] sm:$0xf] %v5140_v54  ;;  %v6002_v60 = vld [vmem:[%s5929_s6 + $0x134] ss:$8 sps:$4 sm:$0xff]   ;;  %v523_v15 = vpack.c.bf16 %v5852_v33, %v521_v10  ;;  %v2089_v17 = vsel %vm324_vm0, %v2075_v57, %v5881_v1 }
  0x23   : > { %v5204_v61 = vld [vmem:[%s5929_s6 + $0x138] sm:$0xf]  ;;  %427 = vst [vmem:[#allocation8 + $0x14] sm:$0xf] %v425_v48  ;;  %476 = vst [vmem:[#allocation8 + $0x1c] sm:$0xf] %v474_v49  ;;  %v2173_v18 = vunpack.c.l.bf16 %v6002_v60  ;;  %v2091_v22 = vpack.c.bf16 %v5852_v33, %v2089_v17  ;;  %v2138_v23 = vsel %vm324_vm0, %v2124_v58, %v5881_v1  ;;  %v619_v24 = vsel %vm324_vm0, %v605_v2, %v5881_v1 }
  0x24   : > { %2157 = vst [vmem:[#allocation8 + $0x130] sm:$0xf] %v5202_v59  ;;  %2206 = vst [vmem:[#allocation8 + $0x138] sm:$0xf] %v5204_v61  ;;  %v5142_v5 = vld [vmem:[%s5929_s6 + $0x40] sm:$0xf]  ;;  %v2222_v25 = vunpack.c.h.bf16 %v6002_v60  ;;  %v2140_v29 = vpack.c.bf16 %v5852_v33, %v2138_v23  ;;  %v621_v30 = vpack.c.bf16 %v5852_v33, %v619_v24  ;;  %v668_v31 = vsel %vm324_vm0, %v654_v4, %v5881_v1 }
  0x25   : > { %4073 = vmatpush1.bf16.msra.mxu0 %v5720_v11  ;;  %5678 = vmatpush1.bf16.msra.mxu1 %v5720_v11  ;;  %v5144_v6 = vld [vmem:[%s5929_s6 + $0x48] sm:$0xf]  ;;  %v570_v11 = vsel %vm324_vm0, %v556_v56, %v5881_v1  ;;  %687 = vst [vmem:[#allocation8 + $0x40] sm:$0xf] %v5142_v5  ;;  %v6029_v12 = vld [vmem:[%s5929_s6 + $0x44] ss:$8 sps:$4 sm:$0xff]   ;;  %v670_v38 = vpack.c.bf16 %v5852_v33, %v668_v31 }
  0x26   : > { %4074 = vmatprep.subr.bf16.mxu0 %v5851_v3  ;;  %5663 = vmatprep.subr.bf16.mxu1 %v5851_v3  ;;  %736 = vst [vmem:[#allocation8 + $0x48] sm:$0xf] %v5144_v6  ;;  %v5206_v13 = vld [vmem:[%s5929_s6 + $0x140] sm:$0xf]  ;;  %v5208_v14 = vld [vmem:[%s5929_s6 + $0x148] sm:$0xf]  ;;  %v572_v16 = vpack.c.bf16 %v5852_v33, %v570_v11  ;;  %v2236_v40 = vsel %vm324_vm0, %v2222_v25, %v5881_v1  ;;  %v703_v41 = vunpack.c.l.bf16 %v6029_v12  ;;  %v752_v44 = vunpack.c.h.bf16 %v6029_v12 }
  0x27   : > { %2255 = vst [vmem:[#allocation8 + $0x140] sm:$0xf] %v5206_v13  ;;  %v5207_v19 = vld [vmem:[%s5929_s6 + $0x144] ss:$8 sps:$4 sm:$0xff]   ;;  %2304 = vst [vmem:[#allocation8 + $0x148] sm:$0xf] %v5208_v14  ;;  %v2238_v43 = vpack.c.bf16 %v5852_v33, %v2236_v40 }
  0x28   : > { %v5146_v20 = vld [vmem:[%s5929_s6 + $0x50] sm:$0xf]  ;;  %v5148_v21 = vld [vmem:[%s5929_s6 + $0x58] sm:$0xf]  ;;  %1995 = vst [vmem:[#allocation8 + $0x114] sm:$0xf] %v1993_v7  ;;  %v2271_v45 = vunpack.c.l.bf16 %v5207_v19  ;;  %v2320_v46 = vunpack.c.h.bf16 %v5207_v19  ;;  %v717_v48 = vsel %vm324_vm0, %v703_v41, %v5881_v1  ;;  %v766_v53 = vsel %vm324_vm0, %v752_v44, %v5881_v1 }
  0x29   : > { %4075 = vmatpush1.bf16.msra.mxu0 %v5963_v32  ;;  %5679 = vmatpush1.bf16.msra.mxu1 %v5963_v32  ;;  %2044 = vst [vmem:[#allocation8 + $0x11c] sm:$0xf] %v2042_v8  ;;  %785 = vst [vmem:[#allocation8 + $0x50] sm:$0xf] %v5146_v20  ;;  %v6055_v26 = vld [vmem:[%s5929_s6 + $0x54] ss:$8 sps:$4 sm:$0xff]   ;;  %v2187_v32 = vsel %vm324_vm0, %v2173_v18, %v5881_v1  ;;  %v719_v52 = vpack.c.bf16 %v5852_v33, %v717_v48 }
  0x2a   : > { %4076 = vmatprep.subr.bf16.mxu0 %v5851_v3  ;;  %5664 = vmatprep.subr.bf16.mxu1 %v5851_v3  ;;  %834 = vst [vmem:[#allocation8 + $0x58] sm:$0xf] %v5148_v21  ;;  %v5210_v27 = vld [vmem:[%s5929_s6 + $0x150] sm:$0xf]  ;;  %v5212_v28 = vld [vmem:[%s5929_s6 + $0x158] sm:$0xf]  ;;  %v2189_v39 = vpack.c.bf16 %v5852_v33, %v2187_v32  ;;  %v801_v49 = vunpack.c.l.bf16 %v6055_v26  ;;  %v850_v50 = vunpack.c.h.bf16 %v6055_v26  ;;  %v2285_v54 = vsel %vm324_vm0, %v2271_v45, %v5881_v1 }
  0x2b   : > { %525 = vst [vmem:[#allocation8 + $0x24] sm:$0xf] %v523_v15  ;;  %574 = vst [vmem:[#allocation8 + $0x2c] sm:$0xf] %v572_v16  ;;  %v6068_v34 = vld [vmem:[%s5929_s6 + $0x154] ss:$8 sps:$4 sm:$0xff]   ;;  %v2334_v55 = vsel %vm324_vm0, %v2320_v46, %v5881_v1  ;;  %v768_v57 = vpack.c.bf16 %v5852_v33, %v766_v53  ;;  %v2287_v58 = vpack.c.bf16 %v5852_v33, %v2285_v54 }
  0x2c   : > { %2353 = vst [vmem:[#allocation8 + $0x150] sm:$0xf] %v5210_v27  ;;  %2402 = vst [vmem:[#allocation8 + $0x158] sm:$0xf] %v5212_v28  ;;  %v5150_v35 = vld [vmem:[%s5929_s6 + $0x60] sm:$0xf]  ;;  %v2369_v51 = vunpack.c.l.bf16 %v6068_v34  ;;  %v2336_v59 = vpack.c.bf16 %v5852_v33, %v2334_v55  ;;  %v815_v60 = vsel %vm324_vm0, %v801_v49, %v5881_v1  ;;  %v864_v4 = vsel %vm324_vm0, %v850_v50, %v5881_v1 }
  0x2d   : > { %v5152_v36 = vld [vmem:[%s5929_s6 + $0x68] sm:$0xf]  ;;  %v5723_v37 = vld [vmem:[%s6496_s0 + $0x40] sm:$0xff]   ;;  %2093 = vst [vmem:[#allocation8 + $0x124] sm:$0xf] %v2091_v22  ;;  %4077 = vmatpush1.bf16.msra.mxu0 %v6008_v62  ;;  %5680 = vmatpush1.bf16.msra.mxu1 %v6008_v62  ;;  %v817_v2 = vpack.c.bf16 %v5852_v33, %v815_v60  ;;  %v2418_v6 = vunpack.c.h.bf16 %v6068_v34  ;;  %v866_v7 = vpack.c.bf16 %v5852_v33, %v864_v4  ;;  %v5725_v18 = vld [vmem:[%s6496_s0 + $0x50] sm:$0xff]  }
  0x2e   : > { %883 = vst [vmem:[#allocation8 + $0x60] sm:$0xf] %v5150_v35  ;;  %932 = vst [vmem:[#allocation8 + $0x68] sm:$0xf] %v5152_v36  ;;  %v5733_v42 = vld [vmem:[#allocation8 + $0x4] ss:$8 sps:$4 sm:$0xff]   ;;  %4078 = vmatprep.subr.bf16.mxu0 %v5851_v3  ;;  %5665 = vmatprep.subr.bf16.mxu1 %v5851_v3  ;;  %v2383_v5 = vsel %vm324_vm0, %v2369_v51, %v5881_v1 }
  0x2f   : > { %2142 = vst [vmem:[#allocation8 + $0x12c] sm:$0xf] %v2140_v29  ;;  %623 = vst [vmem:[#allocation8 + $0x34] sm:$0xf] %v621_v30  ;;  %v5736_v47 = vld [vmem:[#allocation8 + $0x104] ss:$8 sps:$4 sm:$0xff]   ;;  %4094 = vmatprep.mubr.bf16.mxu0 %v5733_v42  ;;  %v2385_v8 = vpack.c.bf16 %v5852_v33, %v2383_v5  ;;  %v2432_v12 = vsel %vm324_vm0, %v2418_v6, %v5881_v1 }
  0x30   : > { %672 = vst [vmem:[#allocation8 + $0x3c] sm:$0xf] %v670_v38  ;;  %2191 = vst [vmem:[#allocation8 + $0x134] sm:$0xf] %v2189_v39  ;;  %v5151_v56 = vld [vmem:[%s5929_s6 + $0x64] ss:$8 sps:$4 sm:$0xff]   ;;  %4222 = vmatprep.mubr.bf16.mxu1 %v5736_v47  ;;  %v2434_v15 = vpack.c.bf16 %v5852_v33, %v2432_v12 }
  0x31   : > { %2240 = vst [vmem:[#allocation8 + $0x13c] sm:$0xf] %v2238_v43  ;;  %v5214_v61 = vld [vmem:[%s5929_s6 + $0x160] sm:$0xf]  ;;  %v5215_v62 = vld [vmem:[%s5929_s6 + $0x164] ss:$8 sps:$4 sm:$0xff]   ;;  %4079 = vmatpush1.bf16.msra.mxu0 %v5723_v37  ;;  %5681 = vmatpush1.bf16.msra.mxu1 %v5723_v37  ;;  %v899_v10 = vunpack.c.l.bf16 %v5151_v56  ;;  %v948_v11 = vunpack.c.h.bf16 %v5151_v56 }
  0x32   : > { %v5216_v63 = vld [vmem:[%s5929_s6 + $0x168] sm:$0xf]  ;;  %721 = vst [vmem:[#allocation8 + $0x44] sm:$0xf] %v719_v52  ;;  %2451 = vst [vmem:[#allocation8 + $0x160] sm:$0xf] %v5214_v61  ;;  %4080 = vmatprep.subr.bf16.mxu0 %v5851_v3  ;;  %5666 = vmatprep.subr.bf16.mxu1 %v5851_v3  ;;  %v2467_v13 = vunpack.c.l.bf16 %v5215_v62  ;;  %v2516_v14 = vunpack.c.h.bf16 %v5215_v62 }
  0x33   : > { %v5724_v0 = vld [vmem:[%s6496_s0 + $0x48] sm:$0xff]   ;;  %2500 = vst [vmem:[#allocation8 + $0x168] sm:$0xf] %v5216_v63  ;;  %770 = vst [vmem:[#allocation8 + $0x4c] sm:$0xf] %v768_v57  ;;  %v913_v16 = vsel %vm324_vm0, %v899_v10, %v5881_v1  ;;  %v962_v17 = vsel %vm324_vm0, %v948_v11, %v5881_v1  ;;  %v5726_v28 = vld [vmem:[%s6496_s0 + $0x58] sm:$0xff]  }
  0x34   : > { %2289 = vst [vmem:[#allocation8 + $0x144] sm:$0xf] %v2287_v58  ;;  %2338 = vst [vmem:[#allocation8 + $0x14c] sm:$0xf] %v2336_v59  ;;  %v915_v19 = vpack.c.bf16 %v5852_v33, %v913_v16  ;;  %v964_v20 = vpack.c.bf16 %v5852_v33, %v962_v17  ;;  %v2481_v21 = vsel %vm324_vm0, %v2467_v13, %v5881_v1  ;;  %v5154_v25 = vld [vmem:[%s5929_s6 + $0x70] sm:$0xf] }
  0x35   : > { %819 = vst [vmem:[#allocation8 + $0x54] sm:$0xf] %v817_v2  ;;  %868 = vst [vmem:[#allocation8 + $0x5c] sm:$0xf] %v866_v7  ;;  %4081 = vmatpush1.bf16.msra.mxu0 %v5724_v0  ;;  %5682 = vmatpush1.bf16.msra.mxu1 %v5724_v0  ;;  %v2483_v22 = vpack.c.bf16 %v5852_v33, %v2481_v21  ;;  %v2530_v23 = vsel %vm324_vm0, %v2516_v14, %v5881_v1  ;;  %v5155_v26 = vld [vmem:[%s5929_s6 + $0x74] ss:$8 sps:$4 sm:$0xff]  }
  0x36   : > { %2387 = vst [vmem:[#allocation8 + $0x154] sm:$0xf] %v2385_v8  ;;  %4082 = vmatprep.subr.bf16.mxu0 %v5851_v3  ;;  %5667 = vmatprep.subr.bf16.mxu1 %v5851_v3  ;;  %2436 = vst [vmem:[#allocation8 + $0x15c] sm:$0xf] %v2434_v15  ;;  %v2532_v24 = vpack.c.bf16 %v5852_v33, %v2530_v23  ;;  %v5156_v27 = vld [vmem:[%s5929_s6 + $0x78] sm:$0xf]  ;;  %v997_v29 = vunpack.c.l.bf16 %v5155_v26  ;;  %v1046_v30 = vunpack.c.h.bf16 %v5155_v26 }
  0x37   : > { %917 = vst [vmem:[#allocation8 + $0x64] sm:$0xf] %v915_v19  ;;  %966 = vst [vmem:[#allocation8 + $0x6c] sm:$0xf] %v964_v20  ;;  %v5727_v36 = vld [vmem:[%s6496_s0 + $0x60] sm:$0xff]   ;;  %v5728_v38 = vld [vmem:[%s6496_s0 + $0x68] sm:$0xff]  }
  0x38   : > { %2485 = vst [vmem:[#allocation8 + $0x164] sm:$0xf] %v2483_v22  ;;  %981 = vst [vmem:[#allocation8 + $0x70] sm:$0xf] %v5154_v25  ;;  %v1011_v31 = vsel %vm324_vm0, %v997_v29, %v5881_v1  ;;  %v1060_v32 = vsel %vm324_vm0, %v1046_v30, %v5881_v1  ;;  %v5218_v37 = vld [vmem:[%s5929_s6 + $0x170] sm:$0xf] }
  0x39   : > { %4083 = vmatpush1.bf16.msra.mxu0 %v5725_v18  ;;  %5683 = vmatpush1.bf16.msra.mxu1 %v5725_v18  ;;  %2534 = vst [vmem:[#allocation8 + $0x16c] sm:$0xf] %v2532_v24  ;;  %1030 = vst [vmem:[#allocation8 + $0x78] sm:$0xf] %v5156_v27  ;;  %v1013_v34 = vpack.c.bf16 %v5852_v33, %v1011_v31  ;;  %v1062_v35 = vpack.c.bf16 %v5852_v33, %v1060_v32  ;;  %v5219_v39 = vld [vmem:[%s5929_s6 + $0x174] ss:$8 sps:$4 sm:$0xff]  }
  0x3a   : > { %4084 = vmatprep.subr.bf16.mxu0 %v5851_v3  ;;  %5668 = vmatprep.subr.bf16.mxu1 %v5851_v3  ;;  %2549 = vst [vmem:[#allocation8 + $0x170] sm:$0xf] %v5218_v37  ;;  %v5220_v40 = vld [vmem:[%s5929_s6 + $0x178] sm:$0xf]  ;;  %v5158_v41 = vld [vmem:[%s5929_s6 + $0x80] sm:$0xf]  ;;  %v2565_v42 = vunpack.c.l.bf16 %v5219_v39  ;;  %v2614_v43 = vunpack.c.h.bf16 %v5219_v39 }
  0x3b   : > { %1015 = vst [vmem:[#allocation8 + $0x74] sm:$0xf] %v1013_v34  ;;  %1064 = vst [vmem:[#allocation8 + $0x7c] sm:$0xf] %v1062_v35  ;;  %v5159_v44 = vld [vmem:[%s5929_s6 + $0x84] ss:$8 sps:$4 sm:$0xff]  }
  0x3c   : > { %2598 = vst [vmem:[#allocation8 + $0x178] sm:$0xf] %v5220_v40  ;;  %1079 = vst [vmem:[#allocation8 + $0x80] sm:$0xf] %v5158_v41  ;;  %v5160_v45 = vld [vmem:[%s5929_s6 + $0x88] sm:$0xf]  ;;  %v1095_v47 = vunpack.c.l.bf16 %v5159_v44  ;;  %v1144_v48 = vunpack.c.h.bf16 %v5159_v44  ;;  %v2579_v52 = vsel %vm324_vm0, %v2565_v42, %v5881_v1  ;;  %v2628_v53 = vsel %vm324_vm0, %v2614_v43, %v5881_v1 }
  0x3d   : > { %4085 = vmatpush1.bf16.msra.mxu0 %v5726_v28  ;;  %5684 = vmatpush1.bf16.msra.mxu1 %v5726_v28  ;;  %v5222_v46 = vld [vmem:[%s5929_s6 + $0x180] sm:$0xf]  ;;  %1128 = vst [vmem:[#allocation8 + $0x88] sm:$0xf] %v5160_v45  ;;  %v5223_v49 = vld [vmem:[%s5929_s6 + $0x184] ss:$8 sps:$4 sm:$0xff]   ;;  %v2581_v60 = vpack.c.bf16 %v5852_v33, %v2579_v52  ;;  %v2630_v61 = vpack.c.bf16 %v5852_v33, %v2628_v53 }
  0x3e   : > { %4086 = vmatprep.subr.bf16.mxu0 %v5851_v3  ;;  %5669 = vmatprep.subr.bf16.mxu1 %v5851_v3  ;;  %2647 = vst [vmem:[#allocation8 + $0x180] sm:$0xf] %v5222_v46  ;;  %v5224_v50 = vld [vmem:[%s5929_s6 + $0x188] sm:$0xf]  ;;  %v5162_v51 = vld [vmem:[%s5929_s6 + $0x90] sm:$0xf]  ;;  %v2663_v54 = vunpack.c.l.bf16 %v5223_v49  ;;  %v2712_v55 = vunpack.c.h.bf16 %v5223_v49  ;;  %v1109_v62 = vsel %vm324_vm0, %v1095_v47, %v5881_v1  ;;  %v1158_v2 = vsel %vm324_vm0, %v1144_v48, %v5881_v1 }
  0x3f   : > { %2696 = vst [vmem:[#allocation8 + $0x188] sm:$0xf] %v5224_v50  ;;  %1177 = vst [vmem:[#allocation8 + $0x90] sm:$0xf] %v5162_v51  ;;  %v5163_v56 = vld [vmem:[%s5929_s6 + $0x94] ss:$8 sps:$4 sm:$0xff]   ;;  %v1111_v0 = vpack.c.bf16 %v5852_v33, %v1109_v62  ;;  %v1160_v10 = vpack.c.bf16 %v5852_v33, %v1158_v2 }
  0x40   : > { %v5164_v57 = vld [vmem:[%s5929_s6 + $0x98] sm:$0xf]  ;;  %v5226_v58 = vld [vmem:[%s5929_s6 + $0x190] sm:$0xf]  ;;  %v1193_v63 = vunpack.c.l.bf16 %v5163_v56  ;;  %v2677_v4 = vsel %vm324_vm0, %v2663_v54, %v5881_v1  ;;  %v1242_v5 = vunpack.c.h.bf16 %v5163_v56  ;;  %v5227_v6 = vld [vmem:[%s5929_s6 + $0x194] ss:$8 sps:$4 sm:$0xff]   ;;  %v2726_v12 = vsel %vm324_vm0, %v2712_v55, %v5881_v1 }
  0x41   : > { %4087 = vmatpush1.bf16.msra.mxu0 %v5727_v36  ;;  %5685 = vmatpush1.bf16.msra.mxu1 %v5727_v36  ;;  %v5729_v59 = vld [vmem:[%s6496_s0 + $0x70] sm:$0xff]   ;;  %1226 = vst [vmem:[#allocation8 + $0x98] sm:$0xf] %v5164_v57  ;;  %2745 = vst [vmem:[#allocation8 + $0x190] sm:$0xf] %v5226_v58  ;;  %v6220_v8 = vld [vmem:[%s6496_s0 + $0x78] sm:$0xff]   ;;  %v2679_v11 = vpack.c.bf16 %v5852_v33, %v2677_v4  ;;  %v2728_v17 = vpack.c.bf16 %v5852_v33, %v2726_v12  ;;  %v2761_v20 = vunpack.c.l.bf16 %v5227_v6 }
  0x42   : > { %4088 = vmatprep.subr.bf16.mxu0 %v5851_v3  ;;  %5670 = vmatprep.subr.bf16.mxu1 %v5851_v3  ;;  %v5228_v7 = vld [vmem:[%s5929_s6 + $0x198] sm:$0xf]  ;;  %2583 = vst [vmem:[#allocation8 + $0x174] sm:$0xf] %v2581_v60  ;;  %2632 = vst [vmem:[#allocation8 + $0x17c] sm:$0xf] %v2630_v61  ;;  %v1207_v13 = vsel %vm324_vm0, %v1193_v63, %v5881_v1  ;;  %v1256_v19 = vsel %vm324_vm0, %v1242_v5, %v5881_v1  ;;  %v2810_v25 = vunpack.c.h.bf16 %v5227_v6 }
  0x43   : > { %2794 = vst [vmem:[#allocation8 + $0x198] sm:$0xf] %v5228_v7  ;;  %v5166_v14 = vld [vmem:[%s5929_s6 + $0xa0] sm:$0xf]  ;;  %v5167_v15 = vld [vmem:[%s5929_s6 + $0xa4] ss:$8 sps:$4 sm:$0xff]   ;;  %v1209_v18 = vpack.c.bf16 %v5852_v33, %v1207_v13  ;;  %v1258_v24 = vpack.c.bf16 %v5852_v33, %v1256_v19  ;;  %v2775_v34 = vsel %vm324_vm0, %v2761_v20, %v5881_v1 }
  0x44   : > { %v5168_v16 = vld [vmem:[%s5929_s6 + $0xa8] sm:$0xf]  ;;  %1113 = vst [vmem:[#allocation8 + $0x84] sm:$0xf] %v1111_v0  ;;  %1275 = vst [vmem:[#allocation8 + $0xa0] sm:$0xf] %v5166_v14  ;;  %v1291_v26 = vunpack.c.l.bf16 %v5167_v15  ;;  %v1340_v27 = vunpack.c.h.bf16 %v5167_v15  ;;  %v2777_v41 = vpack.c.bf16 %v5852_v33, %v2775_v34  ;;  %v2824_v42 = vsel %vm324_vm0, %v2810_v25, %v5881_v1 }
  0x45   : > { %4089 = vmatpush1.bf16.msra.mxu0 %v5728_v38  ;;  %5686 = vmatpush1.bf16.msra.mxu1 %v5728_v38  ;;  %1324 = vst [vmem:[#allocation8 + $0xa8] sm:$0xf] %v5168_v16  ;;  %v5230_v21 = vld [vmem:[%s5929_s6 + $0x1a0] sm:$0xf]  ;;  %v5231_v22 = vld [vmem:[%s5929_s6 + $0x1a4] ss:$8 sps:$4 sm:$0xff]   ;;  %v2826_v48 = vpack.c.bf16 %v5852_v33, %v2824_v42 }
  0x46   : > { %4090 = vmatprep.subr.bf16.mxu0 %v5851_v3  ;;  %5671 = vmatprep.subr.bf16.mxu1 %v5851_v3  ;;  %v5232_v23 = vld [vmem:[%s5929_s6 + $0x1a8] sm:$0xf]  ;;  %1162 = vst [vmem:[#allocation8 + $0x8c] sm:$0xf] %v1160_v10  ;;  %2681 = vst [vmem:[#allocation8 + $0x184] sm:$0xf] %v2679_v11  ;;  %v2859_v35 = vunpack.c.l.bf16 %v5231_v22  ;;  %v2908_v36 = vunpack.c.h.bf16 %v5231_v22  ;;  %v1305_v43 = vsel %vm324_vm0, %v1291_v26, %v5881_v1 }
  0x47   : > { %2843 = vst [vmem:[#allocation8 + $0x1a0] sm:$0xf] %v5230_v21  ;;  %2892 = vst [vmem:[#allocation8 + $0x1a8] sm:$0xf] %v5232_v23  ;;  %v5170_v28 = vld [vmem:[%s5929_s6 + $0xb0] sm:$0xf]  ;;  %v1354_v44 = vsel %vm324_vm0, %v1340_v27, %v5881_v1  ;;  %v1307_v49 = vpack.c.bf16 %v5852_v33, %v1305_v43 }
  0x48   : > { %v5171_v29 = vld [vmem:[%s5929_s6 + $0xb4] ss:$8 sps:$4 sm:$0xff]   ;;  %v5172_v30 = vld [vmem:[%s5929_s6 + $0xb8] sm:$0xf]  ;;  %2730 = vst [vmem:[#allocation8 + $0x18c] sm:$0xf] %v2728_v17  ;;  %v1356_v50 = vpack.c.bf16 %v5852_v33, %v1354_v44  ;;  %v2873_v51 = vsel %vm324_vm0, %v2859_v35, %v5881_v1  ;;  %v2922_v57 = vsel %vm324_vm0, %v2908_v36, %v5881_v1 }
  0x49   : > { %4091 = vmatpush1.bf16.msra.mxu0 %v5729_v59  ;;  %5687 = vmatpush1.bf16.msra.mxu1 %v5729_v59  ;;  %v5731_v31 = vld [vmem:[#allocation8] ss:$8 sps:$4 sm:$0xff]   ;;  %1211 = vst [vmem:[#allocation8 + $0x94] sm:$0xf] %v1209_v18  ;;  %1373 = vst [vmem:[#allocation8 + $0xb0] sm:$0xf] %v5170_v28  ;;  %v1389_v37 = vunpack.c.l.bf16 %v5171_v29  ;;  %v2875_v56 = vpack.c.bf16 %v5852_v33, %v2873_v51  ;;  %v1438_v59 = vunpack.c.h.bf16 %v5171_v29 }
  0x4a   : > { %4092 = vmatprep.subr.bf16.mxu0 %v5851_v3  ;;  %5672 = vmatprep.subr.bf16.mxu1 %v5851_v3  ;;  %v5734_v32 = vld [vmem:[#allocation8 + $0x100] ss:$8 sps:$4 sm:$0xff]   ;;  %1422 = vst [vmem:[#allocation8 + $0xb8] sm:$0xf] %v5172_v30  ;;  %v5235_v39 = vld [vmem:[%s5929_s6 + $0x1b4] ss:$8 sps:$4 sm:$0xff]   ;;  %v2924_v62 = vpack.c.bf16 %v5852_v33, %v2922_v57 }
  0x4b   : > { %v5234_v38 = vld [vmem:[%s5929_s6 + $0x1b0] sm:$0xf]  ;;  %v5236_v40 = vld [vmem:[%s5929_s6 + $0x1b8] sm:$0xf]  ;;  %v5737_v3 = vld [vmem:[#allocation8 + $0x14] ss:$8 sps:$4 sm:$0xff]   ;;  %v1403_v58 = vsel %vm324_vm0, %v1389_v37, %v5881_v1  ;;  %v2957_v0 = vunpack.c.l.bf16 %v5235_v39  ;;  %v3006_v2 = vunpack.c.h.bf16 %v5235_v39  ;;  %v1452_v5 = vsel %vm324_vm0, %v1438_v59, %v5881_v1 }
  0x4c   : > { %1260 = vst [vmem:[#allocation8 + $0x9c] sm:$0xf] %v1258_v24  ;;  %2941 = vst [vmem:[#allocation8 + $0x1b0] sm:$0xf] %v5234_v38  ;;  %v5174_v45 = vld [vmem:[%s5929_s6 + $0xc0] sm:$0xf]  ;;  %v1405_v63 = vpack.c.bf16 %v5852_v33, %v1403_v58  ;;  %v1454_v11 = vpack.c.bf16 %v5852_v33, %v1452_v5 }
  0x4d   : > { %2990 = vst [vmem:[#allocation8 + $0x1b8] sm:$0xf] %v5236_v40  ;;  %v5175_v46 = vld [vmem:[%s5929_s6 + $0xc4] ss:$8 sps:$4 sm:$0xff]   ;;  %v5176_v47 = vld [vmem:[%s5929_s6 + $0xc8] sm:$0xf]  ;;  %4093 = vmatpush1.bf16.msra.mxu0 %v6220_v8  ;;  %5688 = vmatpush1.bf16.msra.mxu1 %v6220_v8  ;;  %v2971_v12 = vsel %vm324_vm0, %v2957_v0, %v5881_v1  ;;  %v3020_v13 = vsel %vm324_vm0, %v3006_v2, %v5881_v1 }
  0x4e   : > { %1471 = vst [vmem:[#allocation8 + $0xc0] sm:$0xf] %v5174_v45  ;;  %1520 = vst [vmem:[#allocation8 + $0xc8] sm:$0xf] %v5176_v47  ;;  %v5238_v52 = vld [vmem:[%s5929_s6 + $0x1c0] sm:$0xf]  ;;  %v1487_v6 = vunpack.c.l.bf16 %v5175_v46  ;;  %v1536_v7 = vunpack.c.h.bf16 %v5175_v46  ;;  %v2973_v15 = vpack.c.bf16 %v5852_v33, %v2971_v12  ;;  %v3022_v16 = vpack.c.bf16 %v5852_v33, %v3020_v13 }
  0x4f   : > { %v5239_v53 = vld [vmem:[%s5929_s6 + $0x1c4] ss:$8 sps:$4 sm:$0xff]   ;;  %v5240_v54 = vld [vmem:[%s5929_s6 + $0x1c8] sm:$0xf]  ;;  %2779 = vst [vmem:[#allocation8 + $0x194] sm:$0xf] %v2777_v41 }
  0x50   : > { %v5739_v55 = vld [vmem:[#allocation8 + $0x114] ss:$8 sps:$4 sm:$0xff]   ;;  %3039 = vst [vmem:[#allocation8 + $0x1c0] sm:$0xf] %v5238_v52  ;;  %3088 = vst [vmem:[#allocation8 + $0x1c8] sm:$0xf] %v5240_v54  ;;  %v3055_v8 = vunpack.c.l.bf16 %v5239_v53  ;;  %4095 = vmatmul.mubr.bf16.vlgmr.msra.gmra.mrb[0].mxu0 %v5731_v31  ;;  %4223 = vmatmul.mubr.bf16.vlgmr.msra.gmra.mrb[0].mxu1 %v5734_v32  ;;  %v3104_v14 = vunpack.c.h.bf16 %v5239_v53  ;;  %v1501_v17 = vsel %vm324_vm0, %v1487_v6, %v5881_v1 }
  0x51   : > { %v5178_v60 = vld [vmem:[%s5929_s6 + $0xd0] sm:$0xf]  ;;  %v5180_v61 = vld [vmem:[%s5929_s6 + $0xd8] sm:$0xf]  ;;  %2828 = vst [vmem:[#allocation8 + $0x19c] sm:$0xf] %v2826_v48  ;;  %4102 = vmatprep.mubr.bf16.mxu0 %v5737_v3  ;;  %4230 = vmatprep.mubr.bf16.mxu1 %v5739_v55  ;;  %v1503_v19 = vpack.c.bf16 %v5852_v33, %v1501_v17  ;;  %v1550_v20 = vsel %vm324_vm0, %v1536_v7, %v5881_v1 }
  0x52   : > { %1309 = vst [vmem:[#allocation8 + $0xa4] sm:$0xf] %v1307_v49  ;;  %1358 = vst [vmem:[#allocation8 + $0xac] sm:$0xf] %v1356_v50  ;;  %v5179_v4 = vld [vmem:[%s5929_s6 + $0xd4] ss:$8 sps:$4 sm:$0xff]   ;;  %v3069_v21 = vsel %vm324_vm0, %v3055_v8, %v5881_v1  ;;  %v3118_v22 = vsel %vm324_vm0, %v3104_v14, %v5881_v1  ;;  %v1552_v25 = vpack.c.bf16 %v5852_v33, %v1550_v20 }
  0x53   : > { %1569 = vst [vmem:[#allocation8 + $0xd0] sm:$0xf] %v5178_v60  ;;  %1618 = vst [vmem:[#allocation8 + $0xd8] sm:$0xf] %v5180_v61  ;;  %v5242_v10 = vld [vmem:[%s5929_s6 + $0x1d0] sm:$0xf]  ;;  %v1585_v18 = vunpack.c.l.bf16 %v5179_v4  ;;  %v3071_v26 = vpack.c.bf16 %v5852_v33, %v3069_v21  ;;  %v3120_v27 = vpack.c.bf16 %v5852_v33, %v3118_v22  ;;  %v1634_v31 = vunpack.c.h.bf16 %v5179_v4 }
  0x54   : > { %2877 = vst [vmem:[#allocation8 + $0x1a4] sm:$0xf] %v2875_v56  ;;  %2926 = vst [vmem:[#allocation8 + $0x1ac] sm:$0xf] %v2924_v62  ;;  %v5741_v23 = vld [vmem:[#allocation8 + $0x10] ss:$8 sps:$4 sm:$0xff]  }
  0x55   : > { %1407 = vst [vmem:[#allocation8 + $0xb4] sm:$0xf] %v1405_v63  ;;  %3137 = vst [vmem:[#allocation8 + $0x1d0] sm:$0xf] %v5242_v10  ;;  %v5742_v24 = vld [vmem:[#allocation8 + $0x110] ss:$8 sps:$4 sm:$0xff]   ;;  %v1599_v28 = vsel %vm324_vm0, %v1585_v18, %v5881_v1  ;;  %v1648_v39 = vsel %vm324_vm0, %v1634_v31, %v5881_v1 }
  0x56   : > { %1456 = vst [vmem:[#allocation8 + $0xbc] sm:$0xf] %v1454_v11  ;;  %2975 = vst [vmem:[#allocation8 + $0x1b4] sm:$0xf] %v2973_v15  ;;  %v5243_v29 = vld [vmem:[%s5929_s6 + $0x1d4] ss:$8 sps:$4 sm:$0xff]   ;;  %v1601_v30 = vpack.c.bf16 %v5852_v33, %v1599_v28  ;;  %v1650_v41 = vpack.c.bf16 %v5852_v33, %v1648_v39 }
  0x57   : > { %3024 = vst [vmem:[#allocation8 + $0x1bc] sm:$0xf] %v3022_v16  ;;  %1505 = vst [vmem:[#allocation8 + $0xc4] sm:$0xf] %v1503_v19  ;;  %v3153_v32 = vunpack.c.l.bf16 %v5243_v29  ;;  %v5244_v34 = vld [vmem:[%s5929_s6 + $0x1d8] sm:$0xf]  ;;  %v3202_v35 = vunpack.c.h.bf16 %v5243_v29 }
  0x58   : > { %v5182_v36 = vld [vmem:[%s5929_s6 + $0xe0] sm:$0xf]  ;;  %v5743_v37 = vld [vmem:[#allocation8 + $0x24] ss:$8 sps:$4 sm:$0xff]   ;;  %1554 = vst [vmem:[#allocation8 + $0xcc] sm:$0xf] %v1552_v25  ;;  %4103 = vmatmul.mubr.bf16.gmra.mrb[4].mxu0 %v5741_v23  ;;  %4231 = vmatmul.mubr.bf16.gmra.mrb[4].mxu1 %v5742_v24 }
  0x59   : > { %v5745_v38 = vld [vmem:[#allocation8 + $0x124] ss:$8 sps:$4 sm:$0xff]   ;;  %3073 = vst [vmem:[#allocation8 + $0x1c4] sm:$0xf] %v3071_v26  ;;  %3122 = vst [vmem:[#allocation8 + $0x1cc] sm:$0xf] %v3120_v27  ;;  %v3167_v40 = vsel %vm324_vm0, %v3153_v32, %v5881_v1  ;;  %v3216_v3 = vsel %vm324_vm0, %v3202_v35, %v5881_v1  ;;  %4110 = vmatprep.mubr.bf16.mxu0 %v5743_v37 }
  0x5a   : > { %3186 = vst [vmem:[#allocation8 + $0x1d8] sm:$0xf] %v5244_v34  ;;  %1667 = vst [vmem:[#allocation8 + $0xe0] sm:$0xf] %v5182_v36  ;;  %v3169_v42 = vpack.c.bf16 %v5852_v33, %v3167_v40  ;;  %v3218_v43 = vpack.c.bf16 %v5852_v33, %v3216_v3  ;;  %4238 = vmatprep.mubr.bf16.mxu1 %v5745_v38  ;;  %v5747_v44 = vld [vmem:[#allocation8 + $0x20] ss:$8 sps:$4 sm:$0xff]  }
  0x5b   : > { %1603 = vst [vmem:[#allocation8 + $0xd4] sm:$0xf] %v1601_v30  ;;  %1652 = vst [vmem:[#allocation8 + $0xdc] sm:$0xf] %v1650_v41  ;;  %v5183_v45 = vld [vmem:[%s5929_s6 + $0xe4] ss:$8 sps:$4 sm:$0xff]  }
  0x5c   : > { %3171 = vst [vmem:[#allocation8 + $0x1d4] sm:$0xf] %v3169_v42  ;;  %3220 = vst [vmem:[#allocation8 + $0x1dc] sm:$0xf] %v3218_v43  ;;  %v5748_v46 = vld [vmem:[#allocation8 + $0x120] ss:$8 sps:$4 sm:$0xff]   ;;  %v1683_v47 = vunpack.c.l.bf16 %v5183_v45  ;;  %v1732_v48 = vunpack.c.h.bf16 %v5183_v45 }
  0x5d   : > { %v5749_v49 = vld [vmem:[#allocation8 + $0x34] ss:$8 sps:$4 sm:$0xff]   ;;  %v5184_v52 = vld [vmem:[%s5929_s6 + $0xe8] sm:$0xf]  ;;  %v5246_v56 = vld [vmem:[%s5929_s6 + $0x1e0] sm:$0xf] }
  0x5e   : > { %v5751_v50 = vld [vmem:[#allocation8 + $0x134] ss:$8 sps:$4 sm:$0xff]   ;;  %v1697_v51 = vsel %vm324_vm0, %v1683_v47, %v5881_v1  ;;  %v1746_v53 = vsel %vm324_vm0, %v1732_v48, %v5881_v1  ;;  %1716 = vst [vmem:[#allocation8 + $0xe8] sm:$0xf] %v5184_v52  ;;  %v5248_v58 = vld [vmem:[%s5929_s6 + $0x1e8] sm:$0xf] }
  0x5f   : > { %v1699_v54 = vpack.c.bf16 %v5852_v33, %v1697_v51  ;;  %v1748_v55 = vpack.c.bf16 %v5852_v33, %v1746_v53  ;;  %v5247_v57 = vld [vmem:[%s5929_s6 + $0x1e4] ss:$8 sps:$4 sm:$0xff]   ;;  %3235 = vst [vmem:[#allocation8 + $0x1e0] sm:$0xf] %v5246_v56  ;;  %3284 = vst [vmem:[#allocation8 + $0x1e8] sm:$0xf] %v5248_v58 }
  0x60   : > { %4111 = vmatmul.mubr.bf16.gmra.mrb[8].mxu0 %v5747_v44  ;;  %4239 = vmatmul.mubr.bf16.gmra.mrb[8].mxu1 %v5748_v46  ;;  %v3251_v59 = vunpack.c.l.bf16 %v5247_v57  ;;  %v3300_v60 = vunpack.c.h.bf16 %v5247_v57  ;;  %v5186_v63 = vld [vmem:[%s5929_s6 + $0xf0] sm:$0xf]  ;;  %v5187_v0 = vld [vmem:[%s5929_s6 + $0xf4] ss:$8 sps:$4 sm:$0xff]   ;;  %v5188_v6 = vld [vmem:[%s5929_s6 + $0xf8] sm:$0xf] }
  0x61   : > { %4118 = vmatprep.mubr.bf16.mxu0 %v5749_v49  ;;  %4246 = vmatprep.mubr.bf16.mxu1 %v5751_v50  ;;  %1701 = vst [vmem:[#allocation8 + $0xe4] sm:$0xf] %v1699_v54  ;;  %1750 = vst [vmem:[#allocation8 + $0xec] sm:$0xf] %v1748_v55  ;;  %v1781_v5 = vunpack.c.l.bf16 %v5187_v0  ;;  %v1830_v7 = vunpack.c.h.bf16 %v5187_v0  ;;  %v5250_v8 = vld [vmem:[%s5929_s6 + $0x1f0] sm:$0xf] }
  0x62   : > { %v3265_v61 = vsel %vm324_vm0, %v3251_v59, %v5881_v1  ;;  %v3314_v62 = vsel %vm324_vm0, %v3300_v60, %v5881_v1  ;;  %1765 = vst [vmem:[#allocation8 + $0xf0] sm:$0xf] %v5186_v63  ;;  %v5251_v10 = vld [vmem:[%s5929_s6 + $0x1f4] ss:$8 sps:$4 sm:$0xff]   ;;  %v5753_v11 = vld [vmem:[#allocation8 + $0x30] ss:$8 sps:$4 sm:$0xff]  }
  0x63   : > { %v3267_v2 = vpack.c.bf16 %v5852_v33, %v3265_v61  ;;  %v3316_v4 = vpack.c.bf16 %v5852_v33, %v3314_v62  ;;  %v5754_v12 = vld [vmem:[#allocation8 + $0x130] ss:$8 sps:$4 sm:$0xff]   ;;  %1814 = vst [vmem:[#allocation8 + $0xf8] sm:$0xf] %v5188_v6  ;;  %3333 = vst [vmem:[#allocation8 + $0x1f0] sm:$0xf] %v5250_v8  ;;  %v3349_v13 = vunpack.c.l.bf16 %v5251_v10  ;;  %v3398_v15 = vunpack.c.h.bf16 %v5251_v10 }
  0x64   : > { %v5252_v14 = vld [vmem:[%s5929_s6 + $0x1f8] sm:$0xf]  ;;  %v5755_v16 = vld [vmem:[#allocation8 + $0x44] ss:$8 sps:$4 sm:$0xff]   ;;  %v1795_v18 = vsel %vm324_vm0, %v1781_v5, %v5881_v1  ;;  %v1844_v19 = vsel %vm324_vm0, %v1830_v7, %v5881_v1  ;;  %v5761_v28 = vld [vmem:[#allocation8 + $0x54] ss:$8 sps:$4 sm:$0xff]  }
  0x65   : > { %v5757_v17 = vld [vmem:[#allocation8 + $0x144] ss:$8 sps:$4 sm:$0xff]   ;;  %3269 = vst [vmem:[#allocation8 + $0x1e4] sm:$0xf] %v3267_v2  ;;  %3318 = vst [vmem:[#allocation8 + $0x1ec] sm:$0xf] %v3316_v4  ;;  %v1797_v20 = vpack.c.bf16 %v5852_v33, %v1795_v18  ;;  %v1846_v21 = vpack.c.bf16 %v5852_v33, %v1844_v19  ;;  %v3363_v22 = vsel %vm324_vm0, %v3349_v13, %v5881_v1 }
  0x66   : > { %3382 = vst [vmem:[#allocation8 + $0x1f8] sm:$0xf] %v5252_v14  ;;  %v3412_v23 = vsel %vm324_vm0, %v3398_v15, %v5881_v1  ;;  %v3365_v24 = vpack.c.bf16 %v5852_v33, %v3363_v22  ;;  %v5759_v26 = vld [vmem:[#allocation8 + $0x40] ss:$8 sps:$4 sm:$0xff]   ;;  %v5763_v29 = vld [vmem:[#allocation8 + $0x154] ss:$8 sps:$4 sm:$0xff]  }
  0x67   : > { %v3414_v25 = vpack.c.bf16 %v5852_v33, %v3412_v23  ;;  %1799 = vst [vmem:[#allocation8 + $0xf4] sm:$0xf] %v1797_v20  ;;  %1848 = vst [vmem:[#allocation8 + $0xfc] sm:$0xf] %v1846_v21  ;;  %v5760_v27 = vld [vmem:[#allocation8 + $0x140] ss:$8 sps:$4 sm:$0xff]  }
  0x68   : > { %4119 = vmatmul.mubr.bf16.gmra.mrb[12].mxu0 %v5753_v11  ;;  %4247 = vmatmul.mubr.bf16.gmra.mrb[12].mxu1 %v5754_v12  ;;  %3367 = vst [vmem:[#allocation8 + $0x1f4] sm:$0xf] %v3365_v24  ;;  %v5765_v9 = vld [vmem:[#allocation8 + $0x50] ss:$8 sps:$4 sm:$0xff]   ;;  %v5767_v31 = vld [vmem:[#allocation8 + $0x64] ss:$8 sps:$4 sm:$0xff]  }
  0x69   : > { %4126 = vmatprep.mubr.bf16.mxu0 %v5755_v16  ;;  %4254 = vmatprep.mubr.bf16.mxu1 %v5757_v17  ;;  %3416 = vst [vmem:[#allocation8 + $0x1fc] sm:$0xf] %v3414_v25  ;;  %v5766_v30 = vld [vmem:[#allocation8 + $0x150] ss:$8 sps:$4 sm:$0xff]   ;;  %v5769_v33 = vld [vmem:[#allocation8 + $0x164] ss:$8 sps:$4 sm:$0xff]  }
  0x6a   : > { %v5771_v32 = vld [vmem:[#allocation8 + $0x60] ss:$8 sps:$4 sm:$0xff]   ;;  %v5773_v35 = vld [vmem:[#allocation8 + $0x74] ss:$8 sps:$4 sm:$0xff]   ;;  %v5777_v37 = vld [vmem:[#allocation8 + $0x70] ss:$8 sps:$4 sm:$0xff]  }
  0x6b   : > { %v5772_v34 = vld [vmem:[#allocation8 + $0x160] ss:$8 sps:$4 sm:$0xff]   ;;  %v5775_v36 = vld [vmem:[#allocation8 + $0x174] ss:$8 sps:$4 sm:$0xff]   ;;  %v5778_v38 = vld [vmem:[#allocation8 + $0x170] ss:$8 sps:$4 sm:$0xff]  }
  0x6c   : > { %v5779_v39 = vld [vmem:[#allocation8 + $0x84] ss:$8 sps:$4 sm:$0xff]   ;;  %v5783_v3 = vld [vmem:[#allocation8 + $0x80] ss:$8 sps:$4 sm:$0xff]   ;;  %v5785_v42 = vld [vmem:[#allocation8 + $0x94] ss:$8 sps:$4 sm:$0xff]  }
  0x6d   : > { %v5781_v40 = vld [vmem:[#allocation8 + $0x184] ss:$8 sps:$4 sm:$0xff]   ;;  %v5784_v41 = vld [vmem:[#allocation8 + $0x180] ss:$8 sps:$4 sm:$0xff]   ;;  %v5787_v43 = vld [vmem:[#allocation8 + $0x194] ss:$8 sps:$4 sm:$0xff]  }
  0x6e   : > { %v5789_v44 = vld [vmem:[#allocation8 + $0x90] ss:$8 sps:$4 sm:$0xff]   ;;  %v5791_v46 = vld [vmem:[#allocation8 + $0xa4] ss:$8 sps:$4 sm:$0xff]   ;;  %v5795_v48 = vld [vmem:[#allocation8 + $0xa0] ss:$8 sps:$4 sm:$0xff]  }
  0x6f   : > { %v5790_v45 = vld [vmem:[#allocation8 + $0x190] ss:$8 sps:$4 sm:$0xff]   ;;  %v5793_v47 = vld [vmem:[#allocation8 + $0x1a4] ss:$8 sps:$4 sm:$0xff]   ;;  %v5796_v49 = vld [vmem:[#allocation8 + $0x1a0] ss:$8 sps:$4 sm:$0xff]  }
  0x70   : > { %4127 = vmatmul.mubr.bf16.gmra.mrb[16].mxu0 %v5759_v26  ;;  %4255 = vmatmul.mubr.bf16.gmra.mrb[16].mxu1 %v5760_v27  ;;  %v5797_v50 = vld [vmem:[#allocation8 + $0xb4] ss:$8 sps:$4 sm:$0xff]   ;;  %v5801_v52 = vld [vmem:[#allocation8 + $0xb0] ss:$8 sps:$4 sm:$0xff]   ;;  %v5803_v54 = vld [vmem:[#allocation8 + $0xc4] ss:$8 sps:$4 sm:$0xff]  }
  0x71   : > { %4134 = vmatprep.mubr.bf16.mxu0 %v5761_v28  ;;  %4262 = vmatprep.mubr.bf16.mxu1 %v5763_v29  ;;  %v5799_v51 = vld [vmem:[#allocation8 + $0x1b4] ss:$8 sps:$4 sm:$0xff]   ;;  %v5802_v53 = vld [vmem:[#allocation8 + $0x1b0] ss:$8 sps:$4 sm:$0xff]   ;;  %v5805_v55 = vld [vmem:[#allocation8 + $0x1c4] ss:$8 sps:$4 sm:$0xff]  }
  0x72   : > { %v5807_v56 = vld [vmem:[#allocation8 + $0xc0] ss:$8 sps:$4 sm:$0xff]   ;;  %v5809_v58 = vld [vmem:[#allocation8 + $0xd4] ss:$8 sps:$4 sm:$0xff]   ;;  %v5813_v60 = vld [vmem:[#allocation8 + $0xd0] ss:$8 sps:$4 sm:$0xff]  }
  0x73   : > { %v5808_v57 = vld [vmem:[#allocation8 + $0x1c0] ss:$8 sps:$4 sm:$0xff]   ;;  %v5811_v59 = vld [vmem:[#allocation8 + $0x1d4] ss:$8 sps:$4 sm:$0xff]   ;;  %v5814_v61 = vld [vmem:[#allocation8 + $0x1d0] ss:$8 sps:$4 sm:$0xff]  }
  0x74   : > { %v5815_v62 = vld [vmem:[#allocation8 + $0xe4] ss:$8 sps:$4 sm:$0xff]   ;;  %v5819_v0 = vld [vmem:[#allocation8 + $0xe0] ss:$8 sps:$4 sm:$0xff]   ;;  %v5821_v4 = vld [vmem:[#allocation8 + $0xf4] ss:$8 sps:$4 sm:$0xff]  }
  0x75   : > { %v5817_v63 = vld [vmem:[#allocation8 + $0x1e4] ss:$8 sps:$4 sm:$0xff]   ;;  %v5820_v2 = vld [vmem:[#allocation8 + $0x1e0] ss:$8 sps:$4 sm:$0xff]   ;;  %v5823_v5 = vld [vmem:[#allocation8 + $0x1f4] ss:$8 sps:$4 sm:$0xff]  }
  0x76   : > { %v5825_v6 = vld [vmem:[#allocation8 + $0xf0] ss:$8 sps:$4 sm:$0xff]  }
  0x77   : > { %v5826_v7 = vld [vmem:[#allocation8 + $0x1f0] ss:$8 sps:$4 sm:$0xff]  }
  0x78   : > { %4135 = vmatmul.mubr.bf16.gmra.mrb[20].mxu0 %v5765_v9  ;;  %4263 = vmatmul.mubr.bf16.gmra.mrb[20].mxu1 %v5766_v30  ;;  %v6383_v8 = vld [vmem:[%s6497_s1] ss:$0 sm:$0xff] }
  0x79   : > { %4142 = vmatprep.mubr.bf16.mxu0 %v5767_v31  ;;  %4270 = vmatprep.mubr.bf16.mxu1 %v5769_v33 }
  0x80   : > { %4143 = vmatmul.mubr.bf16.gmra.mrb[24].mxu0 %v5771_v32  ;;  %4271 = vmatmul.mubr.bf16.gmra.mrb[24].mxu1 %v5772_v34 }
  0x81   : > { %4150 = vmatprep.mubr.bf16.mxu0 %v5773_v35  ;;  %4278 = vmatprep.mubr.bf16.mxu1 %v5775_v36 }
  0x88   : > { %4151 = vmatmul.mubr.bf16.gmra.mrb[28].mxu0 %v5777_v37  ;;  %4279 = vmatmul.mubr.bf16.gmra.mrb[28].mxu1 %v5778_v38 }
  0x89   : > { %4158 = vmatprep.mubr.bf16.mxu0 %v5779_v39  ;;  %4286 = vmatprep.mubr.bf16.mxu1 %v5781_v40 }
  0x90   : > { %4159 = vmatmul.mubr.bf16.gmra.mrb[32].mxu0 %v5783_v3  ;;  %4287 = vmatmul.mubr.bf16.gmra.mrb[32].mxu1 %v5784_v41 }
  0x91   : > { %4166 = vmatprep.mubr.bf16.mxu0 %v5785_v42  ;;  %4294 = vmatprep.mubr.bf16.mxu1 %v5787_v43 }
  0x98   : > { %4167 = vmatmul.mubr.bf16.gmra.mrb[36].mxu0 %v5789_v44  ;;  %4295 = vmatmul.mubr.bf16.gmra.mrb[36].mxu1 %v5790_v45 }
  0x99   : > { %4174 = vmatprep.mubr.bf16.mxu0 %v5791_v46  ;;  %4302 = vmatprep.mubr.bf16.mxu1 %v5793_v47 }
  0xa0   : > { %4175 = vmatmul.mubr.bf16.gmra.mrb[40].mxu0 %v5795_v48  ;;  %4303 = vmatmul.mubr.bf16.gmra.mrb[40].mxu1 %v5796_v49 }
  0xa1   : > { %4182 = vmatprep.mubr.bf16.mxu0 %v5797_v50  ;;  %4310 = vmatprep.mubr.bf16.mxu1 %v5799_v51 }
  0xa8   : > { %4183 = vmatmul.mubr.bf16.gmra.mrb[44].mxu0 %v5801_v52  ;;  %4311 = vmatmul.mubr.bf16.gmra.mrb[44].mxu1 %v5802_v53 }
  0xa9   : > { %4190 = vmatprep.mubr.bf16.mxu0 %v5803_v54  ;;  %4318 = vmatprep.mubr.bf16.mxu1 %v5805_v55 }
  0xb0   : > { %4191 = vmatmul.mubr.bf16.gmra.mrb[48].mxu0 %v5807_v56  ;;  %4319 = vmatmul.mubr.bf16.gmra.mrb[48].mxu1 %v5808_v57 }
  0xb1   : > { %4198 = vmatprep.mubr.bf16.mxu0 %v5809_v58  ;;  %4326 = vmatprep.mubr.bf16.mxu1 %v5811_v59 }
  0xb8   : > { %4199 = vmatmul.mubr.bf16.gmra.mrb[52].mxu0 %v5813_v60  ;;  %4327 = vmatmul.mubr.bf16.gmra.mrb[52].mxu1 %v5814_v61 }
  0xb9   : > { %4206 = vmatprep.mubr.bf16.mxu0 %v5815_v62  ;;  %4334 = vmatprep.mubr.bf16.mxu1 %v5817_v63 }
  0xc0   : > { %4207 = vmatmul.mubr.bf16.gmra.mrb[56].mxu0 %v5819_v0  ;;  %4335 = vmatmul.mubr.bf16.gmra.mrb[56].mxu1 %v5820_v2 }
  0xc1   : > { %4214 = vmatprep.mubr.bf16.mxu0 %v5821_v4  ;;  %4342 = vmatprep.mubr.bf16.mxu1 %v5823_v5 }
  0xc8   : > { %4215 = vmatmul.mubr.bf16.gmra.mrb[60].mxu0 %v5825_v6  ;;  %4343 = vmatmul.mubr.bf16.gmra.mrb[60].mxu1 %v5826_v7 }
 0x123   : > { %v4096_v10 = vpop.f32.mrb[0].mxu0  ;;  %v4224_v11 = vpop.f32.mrb[0].mxu1 }
 0x124   : > { %v4553_v12 = vadd.f32 %v6383_v8, %v4096_v10  ;;  %v4585_v13 = vadd.f32 %v6383_v8, %v4224_v11  ;;  %v4098_v14 = vpop.f32.mrb[1].mxu0  ;;  %v4226_v15 = vpop.f32.mrb[1].mxu1 }
 0x125   : > { %v4099_v16 = vpop.f32.mrb[2].mxu0  ;;  %v4227_v17 = vpop.f32.mrb[2].mxu1 }
 0x126   : > { %v4554_v18 = vadd.f32 %v6383_v8, %v4099_v16  ;;  %v4586_v19 = vadd.f32 %v6383_v8, %v4227_v17  ;;  %v4101_v20 = vpop.f32.mrb[3].mxu0  ;;  %v4229_v21 = vpop.f32.mrb[3].mxu1  ;;  %v4617_v22 = vmax.f32 %v4553_v12, 0.0  ;;  %v4649_v23 = vmax.f32 %v4585_v13, 0.0 }
 0x128   : > { %v4618_v24 = vmax.f32 %v4554_v18, 0.0  ;;  %v4650_v25 = vmax.f32 %v4586_v19, 0.0 }
 0x12a   : > { %v5469_v26 = vpack.c.bf16 %v4618_v24, %v4617_v22  ;;  %v5549_v27 = vpack.c.bf16 %v4650_v25, %v4649_v23 }
 0x12b   : > { %v4104_v28 = vpop.f32.mrb[4].mxu0  ;;  %v4232_v29 = vpop.f32.mrb[4].mxu1 }
 0x12c   : > { %5470 = vst [vmem:[%s6393_s13] sm:$0xff] %v5469_v26   ;;  %5641 = vst [vmem:[%s6393_s13 + $0x80] sm:$0xff] %v5549_v27   ;;  %v4555_v9 = vadd.f32 %v6383_v8, %v4104_v28  ;;  %v4587_v30 = vadd.f32 %v6383_v8, %v4232_v29  ;;  %v4106_v31 = vpop.f32.mrb[5].mxu0  ;;  %v4234_v33 = vpop.f32.mrb[5].mxu1 }
 0x12d   : > { %v4107_v32 = vpop.f32.mrb[6].mxu0  ;;  %v4235_v34 = vpop.f32.mrb[6].mxu1 }
 0x12e   : > { %v4556_v35 = vadd.f32 %v6383_v8, %v4107_v32  ;;  %v4588_v36 = vadd.f32 %v6383_v8, %v4235_v34  ;;  %v4109_v37 = vpop.f32.mrb[7].mxu0  ;;  %v4237_v38 = vpop.f32.mrb[7].mxu1  ;;  %v4619_v39 = vmax.f32 %v4555_v9, 0.0  ;;  %v4651_v40 = vmax.f32 %v4587_v30, 0.0 }
 0x130   : > { %v4620_v3 = vmax.f32 %v4556_v35, 0.0  ;;  %v4652_v41 = vmax.f32 %v4588_v36, 0.0 }
 0x132   : > { %v5474_v42 = vpack.c.bf16 %v4620_v3, %v4619_v39  ;;  %v5554_v43 = vpack.c.bf16 %v4652_v41, %v4651_v40 }
 0x133   : > { %v4112_v44 = vpop.f32.mrb[8].mxu0  ;;  %v4240_v45 = vpop.f32.mrb[8].mxu1 }
 0x134   : > { %5626 = vst [vmem:[%s6393_s13 + $0x8] sm:$0xff] %v5474_v42   ;;  %5642 = vst [vmem:[%s6393_s13 + $0x88] sm:$0xff] %v5554_v43   ;;  %v4557_v46 = vadd.f32 %v6383_v8, %v4112_v44  ;;  %v4589_v47 = vadd.f32 %v6383_v8, %v4240_v45  ;;  %v4114_v48 = vpop.f32.mrb[9].mxu0  ;;  %v4242_v49 = vpop.f32.mrb[9].mxu1 }
 0x135   : > { %v4115_v50 = vpop.f32.mrb[10].mxu0  ;;  %v4243_v51 = vpop.f32.mrb[10].mxu1 }
 0x136   : > { %v4558_v52 = vadd.f32 %v6383_v8, %v4115_v50  ;;  %v4590_v53 = vadd.f32 %v6383_v8, %v4243_v51  ;;  %v4117_v54 = vpop.f32.mrb[11].mxu0  ;;  %v4245_v55 = vpop.f32.mrb[11].mxu1  ;;  %v4621_v56 = vmax.f32 %v4557_v46, 0.0  ;;  %v4653_v57 = vmax.f32 %v4589_v47, 0.0 }
 0x138   : > { %v4622_v58 = vmax.f32 %v4558_v52, 0.0  ;;  %v4654_v59 = vmax.f32 %v4590_v53, 0.0 }
 0x13a   : > { %v5479_v60 = vpack.c.bf16 %v4622_v58, %v4621_v56  ;;  %v5559_v61 = vpack.c.bf16 %v4654_v59, %v4653_v57 }
 0x13b   : > { %v4120_v62 = vpop.f32.mrb[12].mxu0  ;;  %v4248_v63 = vpop.f32.mrb[12].mxu1 }
 0x13c   : > { %5627 = vst [vmem:[%s6393_s13 + $0x10] sm:$0xff] %v5479_v60   ;;  %5643 = vst [vmem:[%s6393_s13 + $0x90] sm:$0xff] %v5559_v61   ;;  %v4559_v0 = vadd.f32 %v6383_v8, %v4120_v62  ;;  %v4591_v2 = vadd.f32 %v6383_v8, %v4248_v63  ;;  %v4122_v4 = vpop.f32.mrb[13].mxu0  ;;  %v4250_v5 = vpop.f32.mrb[13].mxu1 }
 0x13d   : > { %v4123_v6 = vpop.f32.mrb[14].mxu0  ;;  %v4251_v7 = vpop.f32.mrb[14].mxu1 }
 0x13e   : > { %v4560_v10 = vadd.f32 %v6383_v8, %v4123_v6  ;;  %v4592_v11 = vadd.f32 %v6383_v8, %v4251_v7  ;;  %v4125_v12 = vpop.f32.mrb[15].mxu0  ;;  %v4253_v13 = vpop.f32.mrb[15].mxu1  ;;  %v4623_v14 = vmax.f32 %v4559_v0, 0.0  ;;  %v4655_v15 = vmax.f32 %v4591_v2, 0.0 }
 0x140   : > { %v4624_v16 = vmax.f32 %v4560_v10, 0.0  ;;  %v4656_v17 = vmax.f32 %v4592_v11, 0.0 }
 0x142   : > { %v5484_v18 = vpack.c.bf16 %v4624_v16, %v4623_v14  ;;  %v5564_v19 = vpack.c.bf16 %v4656_v17, %v4655_v15 }
 0x143   : > { %v4128_v20 = vpop.f32.mrb[16].mxu0  ;;  %v4256_v21 = vpop.f32.mrb[16].mxu1 }
 0x144   : > { %5628 = vst [vmem:[%s6393_s13 + $0x18] sm:$0xff] %v5484_v18   ;;  %5644 = vst [vmem:[%s6393_s13 + $0x98] sm:$0xff] %v5564_v19   ;;  %v4561_v22 = vadd.f32 %v6383_v8, %v4128_v20  ;;  %v4593_v23 = vadd.f32 %v6383_v8, %v4256_v21  ;;  %v4130_v24 = vpop.f32.mrb[17].mxu0  ;;  %v4258_v25 = vpop.f32.mrb[17].mxu1 }
 0x145   : > { %v4131_v26 = vpop.f32.mrb[18].mxu0  ;;  %v4259_v27 = vpop.f32.mrb[18].mxu1 }
 0x146   : > { %v4562_v28 = vadd.f32 %v6383_v8, %v4131_v26  ;;  %v4594_v29 = vadd.f32 %v6383_v8, %v4259_v27  ;;  %v4133_v9 = vpop.f32.mrb[19].mxu0  ;;  %v4261_v30 = vpop.f32.mrb[19].mxu1  ;;  %v4625_v31 = vmax.f32 %v4561_v22, 0.0  ;;  %v4657_v33 = vmax.f32 %v4593_v23, 0.0 }
 0x148   : > { %v4626_v32 = vmax.f32 %v4562_v28, 0.0  ;;  %v4658_v34 = vmax.f32 %v4594_v29, 0.0 }
 0x14a   : > { %v5489_v35 = vpack.c.bf16 %v4626_v32, %v4625_v31  ;;  %v5569_v36 = vpack.c.bf16 %v4658_v34, %v4657_v33 }
 0x14b   : > { %v4136_v37 = vpop.f32.mrb[20].mxu0  ;;  %v4264_v38 = vpop.f32.mrb[20].mxu1 }
 0x14c   : > { %5629 = vst [vmem:[%s6393_s13 + $0x20] sm:$0xff] %v5489_v35   ;;  %5645 = vst [vmem:[%s6393_s13 + $0xa0] sm:$0xff] %v5569_v36   ;;  %v4563_v39 = vadd.f32 %v6383_v8, %v4136_v37  ;;  %v4595_v40 = vadd.f32 %v6383_v8, %v4264_v38  ;;  %v4138_v3 = vpop.f32.mrb[21].mxu0  ;;  %v4266_v41 = vpop.f32.mrb[21].mxu1 }
 0x14d   : > { %v4139_v42 = vpop.f32.mrb[22].mxu0  ;;  %v4267_v43 = vpop.f32.mrb[22].mxu1 }
 0x14e   : > { %v4564_v44 = vadd.f32 %v6383_v8, %v4139_v42  ;;  %v4596_v45 = vadd.f32 %v6383_v8, %v4267_v43  ;;  %v4141_v46 = vpop.f32.mrb[23].mxu0  ;;  %v4269_v47 = vpop.f32.mrb[23].mxu1  ;;  %v4627_v48 = vmax.f32 %v4563_v39, 0.0  ;;  %v4659_v49 = vmax.f32 %v4595_v40, 0.0 }
 0x150   : > { %v4628_v50 = vmax.f32 %v4564_v44, 0.0  ;;  %v4660_v51 = vmax.f32 %v4596_v45, 0.0 }
 0x152   : > { %v5494_v52 = vpack.c.bf16 %v4628_v50, %v4627_v48  ;;  %v5574_v53 = vpack.c.bf16 %v4660_v51, %v4659_v49 }
 0x153   : > { %v4144_v54 = vpop.f32.mrb[24].mxu0  ;;  %v4272_v55 = vpop.f32.mrb[24].mxu1 }
 0x154   : > { %5630 = vst [vmem:[%s6393_s13 + $0x28] sm:$0xff] %v5494_v52   ;;  %5646 = vst [vmem:[%s6393_s13 + $0xa8] sm:$0xff] %v5574_v53   ;;  %v4565_v56 = vadd.f32 %v6383_v8, %v4144_v54  ;;  %v4597_v57 = vadd.f32 %v6383_v8, %v4272_v55  ;;  %v4146_v58 = vpop.f32.mrb[25].mxu0  ;;  %v4274_v59 = vpop.f32.mrb[25].mxu1 }
 0x155   : > { %v4147_v60 = vpop.f32.mrb[26].mxu0  ;;  %v4275_v61 = vpop.f32.mrb[26].mxu1 }
 0x156   : > { %v4566_v62 = vadd.f32 %v6383_v8, %v4147_v60  ;;  %v4598_v63 = vadd.f32 %v6383_v8, %v4275_v61  ;;  %v4149_v0 = vpop.f32.mrb[27].mxu0  ;;  %v4277_v2 = vpop.f32.mrb[27].mxu1  ;;  %v4629_v4 = vmax.f32 %v4565_v56, 0.0  ;;  %v4661_v5 = vmax.f32 %v4597_v57, 0.0 }
 0x158   : > { %v4630_v6 = vmax.f32 %v4566_v62, 0.0  ;;  %v4662_v7 = vmax.f32 %v4598_v63, 0.0 }
 0x15a   : > { %v5499_v10 = vpack.c.bf16 %v4630_v6, %v4629_v4  ;;  %v5579_v11 = vpack.c.bf16 %v4662_v7, %v4661_v5 }
 0x15b   : > { %v4152_v12 = vpop.f32.mrb[28].mxu0  ;;  %v4280_v13 = vpop.f32.mrb[28].mxu1 }
 0x15c   : > { %5631 = vst [vmem:[%s6393_s13 + $0x30] sm:$0xff] %v5499_v10   ;;  %5647 = vst [vmem:[%s6393_s13 + $0xb0] sm:$0xff] %v5579_v11   ;;  %v4567_v14 = vadd.f32 %v6383_v8, %v4152_v12  ;;  %v4599_v15 = vadd.f32 %v6383_v8, %v4280_v13  ;;  %v4154_v16 = vpop.f32.mrb[29].mxu0  ;;  %v4282_v17 = vpop.f32.mrb[29].mxu1 }
 0x15d   : > { %v4155_v18 = vpop.f32.mrb[30].mxu0  ;;  %v4283_v19 = vpop.f32.mrb[30].mxu1 }
 0x15e   : > { %v4568_v20 = vadd.f32 %v6383_v8, %v4155_v18  ;;  %v4600_v21 = vadd.f32 %v6383_v8, %v4283_v19  ;;  %v4157_v22 = vpop.f32.mrb[31].mxu0  ;;  %v4285_v23 = vpop.f32.mrb[31].mxu1  ;;  %v4631_v24 = vmax.f32 %v4567_v14, 0.0  ;;  %v4663_v25 = vmax.f32 %v4599_v15, 0.0 }
 0x160   : > { %v4632_v26 = vmax.f32 %v4568_v20, 0.0  ;;  %v4664_v27 = vmax.f32 %v4600_v21, 0.0 }
 0x162   : > { %v5504_v28 = vpack.c.bf16 %v4632_v26, %v4631_v24  ;;  %v5584_v29 = vpack.c.bf16 %v4664_v27, %v4663_v25 }
 0x163   : > { %v4160_v9 = vpop.f32.mrb[32].mxu0  ;;  %v4288_v30 = vpop.f32.mrb[32].mxu1 }
 0x164   : > { %5632 = vst [vmem:[%s6393_s13 + $0x38] sm:$0xff] %v5504_v28   ;;  %5648 = vst [vmem:[%s6393_s13 + $0xb8] sm:$0xff] %v5584_v29   ;;  %v4569_v31 = vadd.f32 %v6383_v8, %v4160_v9  ;;  %v4601_v33 = vadd.f32 %v6383_v8, %v4288_v30  ;;  %v4162_v32 = vpop.f32.mrb[33].mxu0  ;;  %v4290_v34 = vpop.f32.mrb[33].mxu1 }
 0x165   : > { %v4163_v35 = vpop.f32.mrb[34].mxu0  ;;  %v4291_v36 = vpop.f32.mrb[34].mxu1 }
 0x166   : > { %v4570_v37 = vadd.f32 %v6383_v8, %v4163_v35  ;;  %v4602_v38 = vadd.f32 %v6383_v8, %v4291_v36  ;;  %v4165_v39 = vpop.f32.mrb[35].mxu0  ;;  %v4293_v40 = vpop.f32.mrb[35].mxu1  ;;  %v4633_v3 = vmax.f32 %v4569_v31, 0.0  ;;  %v4665_v41 = vmax.f32 %v4601_v33, 0.0 }
 0x168   : > { %v4634_v42 = vmax.f32 %v4570_v37, 0.0  ;;  %v4666_v43 = vmax.f32 %v4602_v38, 0.0 }
 0x16a   : > { %v5509_v44 = vpack.c.bf16 %v4634_v42, %v4633_v3  ;;  %v5589_v45 = vpack.c.bf16 %v4666_v43, %v4665_v41 }
 0x16b   : > { %v4168_v46 = vpop.f32.mrb[36].mxu0  ;;  %v4296_v47 = vpop.f32.mrb[36].mxu1 }
 0x16c   : > { %5633 = vst [vmem:[%s6393_s13 + $0x40] sm:$0xff] %v5509_v44   ;;  %5649 = vst [vmem:[%s6393_s13 + $0xc0] sm:$0xff] %v5589_v45   ;;  %v4571_v48 = vadd.f32 %v6383_v8, %v4168_v46  ;;  %v4603_v49 = vadd.f32 %v6383_v8, %v4296_v47  ;;  %v4170_v50 = vpop.f32.mrb[37].mxu0  ;;  %v4298_v51 = vpop.f32.mrb[37].mxu1 }
 0x16d   : > { %v4171_v52 = vpop.f32.mrb[38].mxu0  ;;  %v4299_v53 = vpop.f32.mrb[38].mxu1 }
 0x16e   : > { %v4572_v54 = vadd.f32 %v6383_v8, %v4171_v52  ;;  %v4604_v55 = vadd.f32 %v6383_v8, %v4299_v53  ;;  %v4173_v56 = vpop.f32.mrb[39].mxu0  ;;  %v4301_v57 = vpop.f32.mrb[39].mxu1  ;;  %v4635_v58 = vmax.f32 %v4571_v48, 0.0  ;;  %v4667_v59 = vmax.f32 %v4603_v49, 0.0 }
 0x170   : > { %v4636_v60 = vmax.f32 %v4572_v54, 0.0  ;;  %v4668_v61 = vmax.f32 %v4604_v55, 0.0 }
 0x172   : > { %v5514_v62 = vpack.c.bf16 %v4636_v60, %v4635_v58  ;;  %v5594_v63 = vpack.c.bf16 %v4668_v61, %v4667_v59 }
 0x173   : > { %v4176_v0 = vpop.f32.mrb[40].mxu0  ;;  %v4304_v2 = vpop.f32.mrb[40].mxu1 }
 0x174   : > { %5634 = vst [vmem:[%s6393_s13 + $0x48] sm:$0xff] %v5514_v62   ;;  %5650 = vst [vmem:[%s6393_s13 + $0xc8] sm:$0xff] %v5594_v63   ;;  %v4573_v4 = vadd.f32 %v6383_v8, %v4176_v0  ;;  %v4605_v5 = vadd.f32 %v6383_v8, %v4304_v2  ;;  %v4178_v6 = vpop.f32.mrb[41].mxu0  ;;  %v4306_v7 = vpop.f32.mrb[41].mxu1 }
 0x175   : > { %v4179_v10 = vpop.f32.mrb[42].mxu0  ;;  %v4307_v11 = vpop.f32.mrb[42].mxu1 }
 0x176   : > { %v4574_v12 = vadd.f32 %v6383_v8, %v4179_v10  ;;  %v4606_v13 = vadd.f32 %v6383_v8, %v4307_v11  ;;  %v4181_v14 = vpop.f32.mrb[43].mxu0  ;;  %v4309_v15 = vpop.f32.mrb[43].mxu1  ;;  %v4637_v16 = vmax.f32 %v4573_v4, 0.0  ;;  %v4669_v17 = vmax.f32 %v4605_v5, 0.0 }
 0x178   : > { %v4638_v18 = vmax.f32 %v4574_v12, 0.0  ;;  %v4670_v19 = vmax.f32 %v4606_v13, 0.0 }
 0x17a   : > { %v5519_v20 = vpack.c.bf16 %v4638_v18, %v4637_v16  ;;  %v5599_v21 = vpack.c.bf16 %v4670_v19, %v4669_v17 }
 0x17b   : > { %v4184_v22 = vpop.f32.mrb[44].mxu0  ;;  %v4312_v23 = vpop.f32.mrb[44].mxu1 }
 0x17c   : > { %5635 = vst [vmem:[%s6393_s13 + $0x50] sm:$0xff] %v5519_v20   ;;  %5651 = vst [vmem:[%s6393_s13 + $0xd0] sm:$0xff] %v5599_v21   ;;  %v4575_v24 = vadd.f32 %v6383_v8, %v4184_v22  ;;  %v4607_v25 = vadd.f32 %v6383_v8, %v4312_v23  ;;  %v4186_v26 = vpop.f32.mrb[45].mxu0  ;;  %v4314_v27 = vpop.f32.mrb[45].mxu1 }
 0x17d   : > { %v4187_v28 = vpop.f32.mrb[46].mxu0  ;;  %v4315_v29 = vpop.f32.mrb[46].mxu1 }
 0x17e   : > { %v4576_v9 = vadd.f32 %v6383_v8, %v4187_v28  ;;  %v4608_v30 = vadd.f32 %v6383_v8, %v4315_v29  ;;  %v4189_v31 = vpop.f32.mrb[47].mxu0  ;;  %v4317_v33 = vpop.f32.mrb[47].mxu1  ;;  %v4639_v32 = vmax.f32 %v4575_v24, 0.0  ;;  %v4671_v34 = vmax.f32 %v4607_v25, 0.0 }
 0x180   : > { %v4640_v35 = vmax.f32 %v4576_v9, 0.0  ;;  %v4672_v36 = vmax.f32 %v4608_v30, 0.0 }
 0x182   : > { %v5524_v37 = vpack.c.bf16 %v4640_v35, %v4639_v32  ;;  %v5604_v38 = vpack.c.bf16 %v4672_v36, %v4671_v34 }
 0x183   : > { %v4192_v39 = vpop.f32.mrb[48].mxu0  ;;  %v4320_v40 = vpop.f32.mrb[48].mxu1 }
 0x184   : > { %5636 = vst [vmem:[%s6393_s13 + $0x58] sm:$0xff] %v5524_v37   ;;  %5652 = vst [vmem:[%s6393_s13 + $0xd8] sm:$0xff] %v5604_v38   ;;  %v4577_v3 = vadd.f32 %v6383_v8, %v4192_v39  ;;  %v4609_v41 = vadd.f32 %v6383_v8, %v4320_v40  ;;  %v4194_v42 = vpop.f32.mrb[49].mxu0  ;;  %v4322_v43 = vpop.f32.mrb[49].mxu1 }
 0x185   : > { %v4195_v44 = vpop.f32.mrb[50].mxu0  ;;  %v4323_v45 = vpop.f32.mrb[50].mxu1 }
 0x186   : > { %v4578_v46 = vadd.f32 %v6383_v8, %v4195_v44  ;;  %v4610_v47 = vadd.f32 %v6383_v8, %v4323_v45  ;;  %v4197_v48 = vpop.f32.mrb[51].mxu0  ;;  %v4325_v49 = vpop.f32.mrb[51].mxu1  ;;  %v4641_v50 = vmax.f32 %v4577_v3, 0.0  ;;  %v4673_v51 = vmax.f32 %v4609_v41, 0.0 }
 0x188   : > { %v4642_v52 = vmax.f32 %v4578_v46, 0.0  ;;  %v4674_v53 = vmax.f32 %v4610_v47, 0.0 }
 0x18a   : > { %v5529_v54 = vpack.c.bf16 %v4642_v52, %v4641_v50  ;;  %v5609_v55 = vpack.c.bf16 %v4674_v53, %v4673_v51 }
 0x18b   : > { %v4200_v56 = vpop.f32.mrb[52].mxu0  ;;  %v4328_v57 = vpop.f32.mrb[52].mxu1 }
 0x18c   : > { %5637 = vst [vmem:[%s6393_s13 + $0x60] sm:$0xff] %v5529_v54   ;;  %5653 = vst [vmem:[%s6393_s13 + $0xe0] sm:$0xff] %v5609_v55   ;;  %v4579_v58 = vadd.f32 %v6383_v8, %v4200_v56  ;;  %v4611_v59 = vadd.f32 %v6383_v8, %v4328_v57  ;;  %v4202_v60 = vpop.f32.mrb[53].mxu0  ;;  %v4330_v61 = vpop.f32.mrb[53].mxu1 }
 0x18d   : > { %v4203_v62 = vpop.f32.mrb[54].mxu0  ;;  %v4331_v63 = vpop.f32.mrb[54].mxu1 }
 0x18e   : > { %v4580_v0 = vadd.f32 %v6383_v8, %v4203_v62  ;;  %v4612_v2 = vadd.f32 %v6383_v8, %v4331_v63  ;;  %v4205_v4 = vpop.f32.mrb[55].mxu0  ;;  %v4333_v5 = vpop.f32.mrb[55].mxu1  ;;  %v4643_v6 = vmax.f32 %v4579_v58, 0.0  ;;  %v4675_v7 = vmax.f32 %v4611_v59, 0.0 }
 0x190   : > { %v4644_v10 = vmax.f32 %v4580_v0, 0.0  ;;  %v4676_v11 = vmax.f32 %v4612_v2, 0.0 }
 0x192   : > { %v5534_v12 = vpack.c.bf16 %v4644_v10, %v4643_v6  ;;  %v5614_v13 = vpack.c.bf16 %v4676_v11, %v4675_v7 }
 0x193   : > { %v4208_v14 = vpop.f32.mrb[56].mxu0  ;;  %v4336_v15 = vpop.f32.mrb[56].mxu1 }
 0x194   : > { %5638 = vst [vmem:[%s6393_s13 + $0x68] sm:$0xff] %v5534_v12   ;;  %5654 = vst [vmem:[%s6393_s13 + $0xe8] sm:$0xff] %v5614_v13   ;;  %v4581_v16 = vadd.f32 %v6383_v8, %v4208_v14  ;;  %v4613_v17 = vadd.f32 %v6383_v8, %v4336_v15  ;;  %v4210_v18 = vpop.f32.mrb[57].mxu0  ;;  %v4338_v19 = vpop.f32.mrb[57].mxu1 }
 0x195   : > { %v4211_v20 = vpop.f32.mrb[58].mxu0  ;;  %v4339_v21 = vpop.f32.mrb[58].mxu1 }
 0x196   : > { %v4582_v22 = vadd.f32 %v6383_v8, %v4211_v20  ;;  %v4614_v23 = vadd.f32 %v6383_v8, %v4339_v21  ;;  %v4213_v24 = vpop.f32.mrb[59].mxu0  ;;  %v4341_v25 = vpop.f32.mrb[59].mxu1  ;;  %v4645_v26 = vmax.f32 %v4581_v16, 0.0  ;;  %v4677_v27 = vmax.f32 %v4613_v17, 0.0 }
 0x198   : > { %v4646_v28 = vmax.f32 %v4582_v22, 0.0  ;;  %v4678_v29 = vmax.f32 %v4614_v23, 0.0 }
 0x19a   : > { %v5539_v9 = vpack.c.bf16 %v4646_v28, %v4645_v26  ;;  %v5619_v30 = vpack.c.bf16 %v4678_v29, %v4677_v27 }
 0x19b   : > { %v4216_v31 = vpop.f32.mrb[60].mxu0  ;;  %v4344_v33 = vpop.f32.mrb[60].mxu1 }
 0x19c   : > { %5639 = vst [vmem:[%s6393_s13 + $0x70] sm:$0xff] %v5539_v9   ;;  %5655 = vst [vmem:[%s6393_s13 + $0xf0] sm:$0xff] %v5619_v30   ;;  %v4583_v32 = vadd.f32 %v6383_v8, %v4216_v31  ;;  %v4615_v34 = vadd.f32 %v6383_v8, %v4344_v33  ;;  %v4218_v35 = vpop.f32.mrb[61].mxu0  ;;  %v4346_v36 = vpop.f32.mrb[61].mxu1 }
 0x19d   : > { %v4219_v37 = vpop.f32.mrb[62].mxu0  ;;  %v4347_v38 = vpop.f32.mrb[62].mxu1 }
 0x19e   : > { %v4584_v39 = vadd.f32 %v6383_v8, %v4219_v37  ;;  %v4616_v40 = vadd.f32 %v6383_v8, %v4347_v38  ;;  %v4221_v3 = vpop.f32.mrb[63].mxu0  ;;  %v4349_v41 = vpop.f32.mrb[63].mxu1  ;;  %v4647_v42 = vmax.f32 %v4583_v32, 0.0  ;;  %v4679_v43 = vmax.f32 %v4615_v34, 0.0 }
 0x1a0   : > { %v4648_v44 = vmax.f32 %v4584_v39, 0.0  ;;  %v4680_v45 = vmax.f32 %v4616_v40, 0.0 }
 0x1a2   : > { %v5544_v46 = vpack.c.bf16 %v4648_v44, %v4647_v42  ;;  %v5624_v47 = vpack.c.bf16 %v4680_v45, %v4679_v43 }
 0x1a4   : > { %5640 = vst [vmem:[%s6393_s13 + $0x78] sm:$0xff] %v5544_v46   ;;  %5656 = vst [vmem:[%s6393_s13 + $0xf8] sm:$0xff] %v5624_v47  }
 0x1a5 PF: > { %s19_s19 = sadd.s32 1, %s5849_s19   ;;  %s6501_s17 = smov %s5845_s18 }
 0x1a6   : > { %p16_p5 = scmp.ge.s32.totalorder %s19_s19, 6   ;;  %s6502_s18 = smov %s6504_s3 }
 0x1a8   :  { %18 = sbr.rel (!%p16_p5) target bundleno = 3 (0x3), region = 330 }

</bundles_post_ra>
